<compile_context>
chip_gen: v6e
topology: v6e:2x2x1
jax: 0.10.0
libtpu: 0.0.40
codegen_flags: <defaults>
</compile_context>

<pallas_src>
import numpy as np
import jax
import jax.numpy as jnp
from jax.experimental import pallas as pl
from jax.experimental.pallas import tpu as pltpu

# ---- small synthetic sizes consistent with the module ----------------------
VOCAB = 50            # trimmed vocab size (synthetic)
E = 100               # word_embed_dim
E_PAD = 128           # E padded to lane width
N_HIDDEN = 32         # n_hidden (small stand-in for 512)
H = N_HIDDEN // 2     # per-direction LSTM hidden size (16)
N_TAGS = 5            # len(vocab.id2label) (synthetic)
OUT_PAD = 128         # tag dim padded to lane width
B = 2                 # batch
T = 8                 # padded sequence length


# ---------------------------------------------------------------------------
# Pallas kernel: fused bidirectional LSTM + tag projection
# ---------------------------------------------------------------------------
def bilstm_tag_kernel(embed_ref,   # (T, B, E_PAD)   time-major embeddings
                      mask_ref,    # (T, B, 2H)      step-s mask: [:H]=valid[s], [H:]=valid[T-1-s]
                      w_in_ref,    # (E_PAD, 8H)     fused input->gates weight (gate-grouped cols)
                      b_in_ref,    # (1, 8H)         fused gate bias (b_ih + b_hh)
                      whh_ref,     # (2H, 8H)        fused block-structured recurrent weight
                      wout_ref,    # (2H, OUT_PAD)   hidden2tag weight (cols zero-padded)
                      bout_ref,    # (1, OUT_PAD)
                      out_ref):    # (T*B, OUT_PAD)  logits, lane-dense
    t_len, bsz, e_pad = embed_ref.shape
    h2 = whh_ref.shape[0]          # 2H  (fwd | bwd state width)
    hdim = h2 // 2                 # H
    g8 = whh_ref.shape[1]          # 8H  (4 gates x 2 directions)

    # ---- hoisted input projection: one MXU matmul for all timesteps & both
    # directions; bias added once here.
    x_flat = embed_ref[...].reshape(t_len * bsz, e_pad)                 # (T*B, E_PAD)
    gx = (jnp.dot(x_flat, w_in_ref[...], preferred_element_type=jnp.float32)
          + b_in_ref[...])                                              # (T*B, 8H)
    gx3 = gx.reshape(t_len, bsz, g8)                                    # (T, B, 8H)

    whh = whh_ref[...]             # hoisted out of the loop
    mask_all = mask_ref[...]       # (T, B, 2H)

    # lane-select mask (hoisted, constant): within each 2H-wide gate group the
    # first H lanes belong to the forward direction, the last H to backward.
    lane = jax.lax.broadcasted_iota(jnp.int32, (bsz, g8), 1)
    fwd_lane = (lane % h2) < hdim                                       # (B, 8H) bool

    h = jnp.zeros((bsz, h2), jnp.float32)   # [h_fwd | h_bwd]
    c = jnp.zeros((bsz, h2), jnp.float32)
    outs_f = [None] * t_len
    outs_b = [None] * t_len

    # ---- fully unrolled interleaved recurrence: at step s the forward
    # direction processes time s while the backward direction processes
    # time T-1-s; both share one recurrent matmul and one gate pass.
    for s in range(t_len):
        tf = s
        tb = t_len - 1 - s
        g = jnp.dot(h, whh, preferred_element_type=jnp.float32)         # (B, 8H) MXU
        g = g + jnp.where(fwd_lane, gx3[tf], gx3[tb])
        # gate-grouped layout: [i | f | g | o], each 2H wide (fwd|bwd)
        i_g = jax.nn.sigmoid(g[:, 0 * h2:1 * h2])
        f_g = jax.nn.sigmoid(g[:, 1 * h2:2 * h2])
        g_g = jnp.tanh(g[:, 2 * h2:3 * h2])
        o_g = jax.nn.sigmoid(g[:, 3 * h2:4 * h2])
        c_new = f_g * c + i_g * g_g
        h_new = o_g * jnp.tanh(c_new)
        # packed-sequence semantics: freeze state / zero output past length
        m = mask_all[s]                                                  # (B, 2H)
        c = m * c_new + (1.0 - m) * c
        h = m * h_new + (1.0 - m) * h
        out_m = m * h_new
        outs_f[tf] = out_m[:, :hdim]     # fwd output at time tf
        outs_b[tb] = out_m[:, hdim:]     # bwd output at time tb

    # ---- hidden2tag: no lane concat — two small matmuls against the row
    # blocks of wout instead, then one lane-dense unmasked store.
    outf = jnp.concatenate(outs_f, axis=0)                               # (T*B, H)
    outb = jnp.concatenate(outs_b, axis=0)                               # (T*B, H)
    logits = (jnp.dot(outf, wout_ref[0:hdim, :],
                      preferred_element_type=jnp.float32)
              + jnp.dot(outb, wout_ref[hdim:, :],
                        preferred_element_type=jnp.float32)
              + bout_ref[...])
    out_ref[...] = logits                                                # (T*B, 128)


# ---------------------------------------------------------------------------
# Wrapper (glue: embedding gather, masks, padded/fused parameter layout)
# ---------------------------------------------------------------------------
def _full_spec(shape):
    zeros = (0,) * len(shape)
    return pl.BlockSpec(shape, lambda *_: zeros)


def compute_lengths(x):
    # StudentModel.len_unpadded: index of first 0 token, else full length
    is_pad = (x == 0)
    has_pad = jnp.any(is_pad, axis=1)
    first_pad = jnp.argmax(is_pad, axis=1)
    return jnp.where(has_pad, first_pad, x.shape[1]).astype(jnp.int32)


def student_forward(x_tokens, kp):
    """Returns full-length logits (B, T, N_TAGS); trimming to the batch's max
    unpadded length (pad_packed_sequence) is done by the caller host-side so
    this wrapper stays jittable (no device->host sync)."""
    bsz, t_len = x_tokens.shape
    lengths = compute_lengths(x_tokens)

    # time-major embedding gather directly (no post-gather transpose pass);
    # dropout(0.4) is eval-mode identity.
    embed_tm = kp["emb"][x_tokens.T]                                  # (T, B, E_PAD)

    valid = (jnp.arange(t_len)[:, None]
             < lengths[None, :]).astype(jnp.float32)                  # (T, B)
    mask_f = jnp.broadcast_to(valid[:, :, None], (t_len, bsz, H))
    mask_b = jnp.broadcast_to(valid[::-1, :, None], (t_len, bsz, H))
    mask_comb = jnp.concatenate([mask_f, mask_b], axis=-1)            # (T, B, 2H)

    inputs = (embed_tm, mask_comb, kp["w_in"], kp["b_in"], kp["whh"],
              kp["wout"], kp["bout"])

    logits = pl.pallas_call(
        bilstm_tag_kernel,
        out_shape=jax.ShapeDtypeStruct((t_len * bsz, OUT_PAD), jnp.float32),
        grid=(1,),
        in_specs=[_full_spec(a.shape) for a in inputs],
        out_specs=_full_spec((t_len * bsz, OUT_PAD)),
        compiler_params=pltpu.CompilerParams(
            dimension_semantics=("arbitrary",)),
    )(*inputs)

    # (T*B, OUT_PAD) -> (B, T, N_TAGS)
    return logits.reshape(t_len, bsz, OUT_PAD).transpose(1, 0, 2)[:, :, :N_TAGS]


# ---------------------------------------------------------------------------
# Deterministic synthetic parameters (PyTorch-style layout; no checkpoint)
# ---------------------------------------------------------------------------
def init_params(key):
    ks = jax.random.split(key, 10)
    bound = 1.0 / np.sqrt(H)

    def u(k, shape):
        return jax.random.uniform(k, shape, jnp.float32, -bound, bound)

    emb = 0.1 * jax.random.normal(ks[0], (VOCAB, E), jnp.float32)
    emb = emb.at[0].set(0.0)  # padding_idx=0
    return {
        "emb": emb,
        "wih_f": u(ks[1], (E, 4 * H)),      # gate order i, f, g, o
        "whh_f": u(ks[2], (H, 4 * H)),
        "b_f": u(ks[3], (1, 4 * H)),        # b_ih + b_hh combined
        "wih_b": u(ks[4], (E, 4 * H)),
        "whh_b": u(ks[5], (H, 4 * H)),
        "b_b": u(ks[6], (1, 4 * H)),
        "wout": u(ks[7], (2 * H, N_TAGS)),
        "bout": u(ks[8], (1, N_TAGS)),
    }


def fuse_params(params):
    """Build the lane-padded, gate-grouped fused weights the kernel expects."""
    def fuse_cols(wf, wb):
        # column layout: [i_f, i_b, f_f, f_b, g_f, g_b, o_f, o_b], each H wide
        blocks = []
        for gi in range(4):
            blocks.append(wf[:, gi * H:(gi + 1) * H])
            blocks.append(wb[:, gi * H:(gi + 1) * H])
        return jnp.concatenate(blocks, axis=1)

    zpad_e = jnp.zeros((E_PAD - E, 4 * H), jnp.float32)
    wih_f_p = jnp.concatenate([params["wih_f"], zpad_e], axis=0)      # (E_PAD, 4H)
    wih_b_p = jnp.concatenate([params["wih_b"], zpad_e], axis=0)
    w_in = fuse_cols(wih_f_p, wih_b_p)                                # (E_PAD, 8H)
    b_in = fuse_cols(params["b_f"], params["b_b"])                    # (1, 8H)

    zh = jnp.zeros((H, 4 * H), jnp.float32)
    whh_f_ext = jnp.concatenate([params["whh_f"], zh], axis=0)        # rows H: zero
    whh_b_ext = jnp.concatenate([zh, params["whh_b"]], axis=0)        # rows :H zero
    whh = fuse_cols(whh_f_ext, whh_b_ext)                             # (2H, 8H)

    wout = jnp.concatenate(
        [params["wout"], jnp.zeros((2 * H, OUT_PAD - N_TAGS), jnp.float32)],
        axis=1)                                                        # (2H, OUT_PAD)
    bout = jnp.concatenate(
        [params["bout"], jnp.zeros((1, OUT_PAD - N_TAGS), jnp.float32)],
        axis=1)                                                        # (1, OUT_PAD)

    emb = jnp.concatenate(
        [params["emb"], jnp.zeros((VOCAB, E_PAD - E), jnp.float32)],
        axis=1)                                                        # (VOCAB, E_PAD)

    return {"emb": emb, "w_in": w_in, "b_in": b_in, "whh": whh,
            "wout": wout, "bout": bout}


# ---------------------------------------------------------------------------
# Pure-JAX reference in the original (PyTorch-style) layout
# ---------------------------------------------------------------------------
def reference_forward(x_tokens, params):
    bsz, t_len = x_tokens.shape
    lengths = compute_lengths(x_tokens)
    emb = params["emb"][x_tokens]                                     # (B, T, E)
    mask = (jnp.arange(t_len)[None, :]
            < lengths[:, None]).astype(jnp.float32)                   # (B, T)

    def run_dir(wih, whh, b, reverse):
        h = jnp.zeros((bsz, H), jnp.float32)
        c = jnp.zeros((bsz, H), jnp.float32)
        outs = [None] * t_len
        order = range(t_len - 1, -1, -1) if reverse else range(t_len)
        for t in order:
            x_t = emb[:, t, :]
            m = mask[:, t][:, None]
            g = x_t @ wih + h @ whh + b[0]
            i_g = jax.nn.sigmoid(g[:, :H])
            f_g = jax.nn.sigmoid(g[:, H:2 * H])
            g_g = jnp.tanh(g[:, 2 * H:3 * H])
            o_g = jax.nn.sigmoid(g[:, 3 * H:])
            c_new = f_g * c + i_g * g_g
            h_new = o_g * jnp.tanh(c_new)
            c = m * c_new + (1 - m) * c
            h = m * h_new + (1 - m) * h
            outs[t] = m * h_new
        return jnp.stack(outs, axis=1)                                # (B, T, H)

    fwd = run_dir(params["wih_f"], params["whh_f"], params["b_f"], False)
    bwd = run_dir(params["wih_b"], params["whh_b"], params["b_b"], True)
    hcat = jnp.concatenate([fwd, bwd], axis=-1)                       # (B, T, 2H)
    return hcat @ params["wout"] + params["bout"][0]                  # (B, T, N_TAGS)


if __name__ == "__main__":
    key = jax.random.PRNGKey(0)
    pkey, xkey = jax.random.split(key)
    params = init_params(pkey)
    kparams = fuse_params(params)

    # tokens (B, T) int32; 0 == padding. seq0 full length, seq1 padded at 5.
    x = jax.random.randint(xkey, (B, T), 1, VOCAB, dtype=jnp.int32)
    x = x.at[1, 5:].set(0)

    fwd_jit = jax.jit(student_forward)
    out_full = jax.block_until_ready(fwd_jit(x, kparams))             # (B, T, N_TAGS)

    # pad_packed_sequence trims to the max unpadded length in the batch;
    # do the trim host-side so the jitted wrapper never syncs.
    t_out = int(np.asarray(compute_lengths(x)).max())
    out = np.asarray(out_full)[:, :t_out, :]

    ref = np.asarray(reference_forward(x, params))[:, :t_out, :]
    np.testing.assert_allclose(out, ref, rtol=1e-4, atol=1e-4)
    print("KERNEL_OK")
</pallas_src>

<mosaic_0001>
module attributes {stable_mosaic.version = 11 : i64} {
  func.func @bilstm_tag_kernel(%arg0: i32, %arg1: memref<8x2x128xf32, #tpu.memory_space<vmem>>, %arg2: memref<8x2x32xf32, #tpu.memory_space<vmem>>, %arg3: memref<128x128xf32, #tpu.memory_space<vmem>>, %arg4: memref<1x128xf32, #tpu.memory_space<vmem>>, %arg5: memref<32x128xf32, #tpu.memory_space<vmem>>, %arg6: memref<32x128xf32, #tpu.memory_space<vmem>>, %arg7: memref<1x128xf32, #tpu.memory_space<vmem>>, %arg8: memref<16x128xf32, #tpu.memory_space<vmem>>) attributes {dimension_semantics = [#tpu.dimension_semantics<arbitrary>], iteration_bounds = array<i64: 1>, scalar_prefetch = 0 : i64, scratch_operands = 0 : i64, tpu.core_type = #tpu.core_type<tc>, window_params = [{pipeline_mode = #tpu.pipeline_mode<synchronous>, transform_indices = @transform_0, window_bounds = array<i64: 8, 2, 128>}, {pipeline_mode = #tpu.pipeline_mode<synchronous>, transform_indices = @transform_1, window_bounds = array<i64: 8, 2, 32>}, {pipeline_mode = #tpu.pipeline_mode<synchronous>, transform_indices = @transform_2, window_bounds = array<i64: 128, 128>}, {pipeline_mode = #tpu.pipeline_mode<synchronous>, transform_indices = @transform_3, window_bounds = array<i64: 1, 128>}, {pipeline_mode = #tpu.pipeline_mode<synchronous>, transform_indices = @transform_4, window_bounds = array<i64: 32, 128>}, {pipeline_mode = #tpu.pipeline_mode<synchronous>, transform_indices = @transform_5, window_bounds = array<i64: 32, 128>}, {pipeline_mode = #tpu.pipeline_mode<synchronous>, transform_indices = @transform_6, window_bounds = array<i64: 1, 128>}, {pipeline_mode = #tpu.pipeline_mode<synchronous>, transform_indices = @transform_7, window_bounds = array<i64: 16, 128>}]} {
    %c0 = arith.constant 0 : index
    %c0_0 = arith.constant 0 : index
    %c0_1 = arith.constant 0 : index
    %0 = vector.load %arg1[%c0, %c0_0, %c0_1] : memref<8x2x128xf32, #tpu.memory_space<vmem>>, vector<8x2x128xf32>
    %1 = vector.shape_cast %0 : vector<8x2x128xf32> to vector<16x128xf32>
    %c0_2 = arith.constant 0 : index
    %c0_3 = arith.constant 0 : index
    %2 = vector.load %arg3[%c0_2, %c0_3] : memref<128x128xf32, #tpu.memory_space<vmem>>, vector<128x128xf32>
    %cst = arith.constant dense<0.000000e+00> : vector<16x128xf32>
    %3 = tpu.matmul %1, %2, %cst {dimension_numbers = #tpu.dot_dimension_numbers<[1], [0], [0], [1], [0, 0, 1, 1], [], []>} : vector<16x128xf32>, vector<128x128xf32>, vector<16x128xf32> -> vector<16x128xf32>
    %c0_4 = arith.constant 0 : index
    %c0_5 = arith.constant 0 : index
    %4 = vector.load %arg4[%c0_4, %c0_5] : memref<1x128xf32, #tpu.memory_space<vmem>>, vector<1x128xf32>
    %5 = vector.broadcast %4 : vector<1x128xf32> to vector<16x128xf32>
    %6 = arith.addf %3, %5 : vector<16x128xf32>
    %7 = vector.shape_cast %6 : vector<16x128xf32> to vector<8x2x128xf32>
    %c0_6 = arith.constant 0 : index
    %c0_7 = arith.constant 0 : index
    %8 = vector.load %arg5[%c0_6, %c0_7] : memref<32x128xf32, #tpu.memory_space<vmem>>, vector<32x128xf32>
    %c0_8 = arith.constant 0 : index
    %c0_9 = arith.constant 0 : index
    %c0_10 = arith.constant 0 : index
    %9 = vector.load %arg2[%c0_8, %c0_9, %c0_10] : memref<8x2x32xf32, #tpu.memory_space<vmem>>, vector<8x2x32xf32>
    %10 = tpu.iota {dimensions = array<i32: 1>} : vector<2x128xi32>
    %c32_i32 = arith.constant 32 : i32
    %c0_i32 = arith.constant 0 : i32
    %11 = arith.cmpi eq, %c32_i32, %c0_i32 : i32
    %c1_i32 = arith.constant 1 : i32
    %12 = arith.select %11, %c1_i32, %c32_i32 : i32
    %13 = vector.broadcast %12 : i32 to vector<2x128xi32>
    %14 = arith.remsi %10, %13 : vector<2x128xi32>
    %c0_i32_11 = arith.constant 0 : i32
    %15 = vector.broadcast %c0_i32_11 : i32 to vector<2x128xi32>
    %16 = arith.cmpi ne, %14, %15 : vector<2x128xi32>
    %c0_i32_12 = arith.constant 0 : i32
    %17 = vector.broadcast %c0_i32_12 : i32 to vector<2x128xi32>
    %18 = arith.cmpi slt, %14, %17 : vector<2x128xi32>
    %c0_i32_13 = arith.constant 0 : i32
    %19 = arith.cmpi slt, %12, %c0_i32_13 : i32
    %20 = vector.broadcast %19 : i1 to vector<2x128xi1>
    %21 = vector.broadcast %20 : vector<2x128xi1> to vector<2x128xi1>
    %22 = arith.xori %18, %21 : vector<2x128xi1>
    %23 = arith.andi %22, %16 : vector<2x128xi1>
    %24 = vector.broadcast %12 : i32 to vector<2x128xi32>
    %25 = arith.addi %14, %24 : vector<2x128xi32>
    %26 = arith.select %23, %25, %14 : vector<2x128xi1>, vector<2x128xi32>
    %c16_i32 = arith.constant 16 : i32
    %27 = vector.broadcast %c16_i32 : i32 to vector<2x128xi32>
    %28 = arith.cmpi slt, %26, %27 : vector<2x128xi32>
    %cst_14 = arith.constant 0.000000e+00 : f32
    %29 = vector.broadcast %cst_14 : f32 to vector<2x32xf32>
    %cst_15 = arith.constant 0.000000e+00 : f32
    %30 = vector.broadcast %cst_15 : f32 to vector<2x32xf32>
    %cst_16 = arith.constant dense<0.000000e+00> : vector<2x128xf32>
    %31 = tpu.matmul %29, %8, %cst_16 {dimension_numbers = #tpu.dot_dimension_numbers<[1], [0], [0], [1], [0, 0, 1, 1], [], []>} : vector<2x32xf32>, vector<32x128xf32>, vector<2x128xf32> -> vector<2x128xf32>
    %32 = vector.extract_strided_slice %7 {offsets = [0, 0, 0], sizes = [1, 2, 128], strides = [1, 1, 1]} : vector<8x2x128xf32> to vector<1x2x128xf32>
    %33 = vector.shape_cast %32 : vector<1x2x128xf32> to vector<2x128xf32>
    %34 = vector.extract_strided_slice %7 {offsets = [7, 0, 0], sizes = [1, 2, 128], strides = [1, 1, 1]} : vector<8x2x128xf32> to vector<1x2x128xf32>
    %35 = vector.shape_cast %34 : vector<1x2x128xf32> to vector<2x128xf32>
    %36 = arith.select %28, %33, %35 : vector<2x128xi1>, vector<2x128xf32>
    %37 = arith.addf %31, %36 : vector<2x128xf32>
    %38 = vector.extract_strided_slice %37 {offsets = [0, 0], sizes = [2, 32], strides = [1, 1]} : vector<2x128xf32> to vector<2x32xf32>
    %39 = arith.negf %38 : vector<2x32xf32>
    %40 = math.exp %39 : vector<2x32xf32>
    %cst_17 = arith.constant 1.000000e+00 : f32
    %41 = vector.broadcast %cst_17 : f32 to vector<2x32xf32>
    %42 = arith.addf %41, %40 : vector<2x32xf32>
    %43 = arith.divf %41, %42 : vector<2x32xf32>
    %44 = vector.extract_strided_slice %37 {offsets = [0, 32], sizes = [2, 32], strides = [1, 1]} : vector<2x128xf32> to vector<2x32xf32>
    %45 = arith.negf %44 : vector<2x32xf32>
    %46 = math.exp %45 : vector<2x32xf32>
    %cst_18 = arith.constant 1.000000e+00 : f32
    %47 = vector.broadcast %cst_18 : f32 to vector<2x32xf32>
    %48 = arith.addf %47, %46 : vector<2x32xf32>
    %49 = arith.divf %47, %48 : vector<2x32xf32>
    %50 = vector.extract_strided_slice %37 {offsets = [0, 64], sizes = [2, 32], strides = [1, 1]} : vector<2x128xf32> to vector<2x32xf32>
    %51 = math.tanh %50 : vector<2x32xf32>
    %52 = vector.extract_strided_slice %37 {offsets = [0, 96], sizes = [2, 32], strides = [1, 1]} : vector<2x128xf32> to vector<2x32xf32>
    %53 = arith.negf %52 : vector<2x32xf32>
    %54 = math.exp %53 : vector<2x32xf32>
    %cst_19 = arith.constant 1.000000e+00 : f32
    %55 = vector.broadcast %cst_19 : f32 to vector<2x32xf32>
    %56 = arith.addf %55, %54 : vector<2x32xf32>
    %57 = arith.divf %55, %56 : vector<2x32xf32>
    %58 = arith.mulf %49, %30 : vector<2x32xf32>
    %59 = arith.mulf %43, %51 : vector<2x32xf32>
    %60 = arith.addf %58, %59 : vector<2x32xf32>
    %61 = math.tanh %60 : vector<2x32xf32>
    %62 = arith.mulf %57, %61 : vector<2x32xf32>
    %63 = vector.extract_strided_slice %9 {offsets = [0, 0, 0], sizes = [1, 2, 32], strides = [1, 1, 1]} : vector<8x2x32xf32> to vector<1x2x32xf32>
    %64 = vector.shape_cast %63 : vector<1x2x32xf32> to vector<2x32xf32>
    %65 = arith.mulf %64, %60 : vector<2x32xf32>
    %cst_20 = arith.constant 1.000000e+00 : f32
    %66 = vector.broadcast %cst_20 : f32 to vector<2x32xf32>
    %67 = arith.subf %66, %64 : vector<2x32xf32>
    %68 = arith.mulf %67, %30 : vector<2x32xf32>
    %69 = arith.addf %65, %68 : vector<2x32xf32>
    %70 = arith.mulf %64, %62 : vector<2x32xf32>
    %cst_21 = arith.constant 1.000000e+00 : f32
    %71 = vector.broadcast %cst_21 : f32 to vector<2x32xf32>
    %72 = arith.subf %71, %64 : vector<2x32xf32>
    %73 = arith.mulf %72, %29 : vector<2x32xf32>
    %74 = arith.addf %70, %73 : vector<2x32xf32>
    %75 = arith.mulf %64, %62 : vector<2x32xf32>
    %76 = vector.extract_strided_slice %75 {offsets = [0, 0], sizes = [2, 16], strides = [1, 1]} : vector<2x32xf32> to vector<2x16xf32>
    %77 = vector.extract_strided_slice %75 {offsets = [0, 16], sizes = [2, 16], strides = [1, 1]} : vector<2x32xf32> to vector<2x16xf32>
    %cst_22 = arith.constant dense<0.000000e+00> : vector<2x128xf32>
    %78 = tpu.matmul %74, %8, %cst_22 {dimension_numbers = #tpu.dot_dimension_numbers<[1], [0], [0], [1], [0, 0, 1, 1], [], []>} : vector<2x32xf32>, vector<32x128xf32>, vector<2x128xf32> -> vector<2x128xf32>
    %79 = vector.extract_strided_slice %7 {offsets = [1, 0, 0], sizes = [1, 2, 128], strides = [1, 1, 1]} : vector<8x2x128xf32> to vector<1x2x128xf32>
    %80 = vector.shape_cast %79 : vector<1x2x128xf32> to vector<2x128xf32>
    %81 = vector.extract_strided_slice %7 {offsets = [6, 0, 0], sizes = [1, 2, 128], strides = [1, 1, 1]} : vector<8x2x128xf32> to vector<1x2x128xf32>
    %82 = vector.shape_cast %81 : vector<1x2x128xf32> to vector<2x128xf32>
    %83 = arith.select %28, %80, %82 : vector<2x128xi1>, vector<2x128xf32>
    %84 = arith.addf %78, %83 : vector<2x128xf32>
    %85 = vector.extract_strided_slice %84 {offsets = [0, 0], sizes = [2, 32], strides = [1, 1]} : vector<2x128xf32> to vector<2x32xf32>
    %86 = arith.negf %85 : vector<2x32xf32>
    %87 = math.exp %86 : vector<2x32xf32>
    %cst_23 = arith.constant 1.000000e+00 : f32
    %88 = vector.broadcast %cst_23 : f32 to vector<2x32xf32>
    %89 = arith.addf %88, %87 : vector<2x32xf32>
    %90 = arith.divf %88, %89 : vector<2x32xf32>
    %91 = vector.extract_strided_slice %84 {offsets = [0, 32], sizes = [2, 32], strides = [1, 1]} : vector<2x128xf32> to vector<2x32xf32>
    %92 = arith.negf %91 : vector<2x32xf32>
    %93 = math.exp %92 : vector<2x32xf32>
    %cst_24 = arith.constant 1.000000e+00 : f32
    %94 = vector.broadcast %cst_24 : f32 to vector<2x32xf32>
    %95 = arith.addf %94, %93 : vector<2x32xf32>
    %96 = arith.divf %94, %95 : vector<2x32xf32>
    %97 = vector.extract_strided_slice %84 {offsets = [0, 64], sizes = [2, 32], strides = [1, 1]} : vector<2x128xf32> to vector<2x32xf32>
    %98 = math.tanh %97 : vector<2x32xf32>
    %99 = vector.extract_strided_slice %84 {offsets = [0, 96], sizes = [2, 32], strides = [1, 1]} : vector<2x128xf32> to vector<2x32xf32>
    %100 = arith.negf %99 : vector<2x32xf32>
    %101 = math.exp %100 : vector<2x32xf32>
    %cst_25 = arith.constant 1.000000e+00 : f32
    %102 = vector.broadcast %cst_25 : f32 to vector<2x32xf32>
    %103 = arith.addf %102, %101 : vector<2x32xf32>
    %104 = arith.divf %102, %103 : vector<2x32xf32>
    %105 = arith.mulf %96, %69 : vector<2x32xf32>
    %106 = arith.mulf %90, %98 : vector<2x32xf32>
    %107 = arith.addf %105, %106 : vector<2x32xf32>
    %108 = math.tanh %107 : vector<2x32xf32>
    %109 = arith.mulf %104, %108 : vector<2x32xf32>
    %110 = vector.extract_strided_slice %9 {offsets = [1, 0, 0], sizes = [1, 2, 32], strides = [1, 1, 1]} : vector<8x2x32xf32> to vector<1x2x32xf32>
    %111 = vector.shape_cast %110 : vector<1x2x32xf32> to vector<2x32xf32>
    %112 = arith.mulf %111, %107 : vector<2x32xf32>
    %cst_26 = arith.constant 1.000000e+00 : f32
    %113 = vector.broadcast %cst_26 : f32 to vector<2x32xf32>
    %114 = arith.subf %113, %111 : vector<2x32xf32>
    %115 = arith.mulf %114, %69 : vector<2x32xf32>
    %116 = arith.addf %112, %115 : vector<2x32xf32>
    %117 = arith.mulf %111, %109 : vector<2x32xf32>
    %cst_27 = arith.constant 1.000000e+00 : f32
    %118 = vector.broadcast %cst_27 : f32 to vector<2x32xf32>
    %119 = arith.subf %118, %111 : vector<2x32xf32>
    %120 = arith.mulf %119, %74 : vector<2x32xf32>
    %121 = arith.addf %117, %120 : vector<2x32xf32>
    %122 = arith.mulf %111, %109 : vector<2x32xf32>
    %123 = vector.extract_strided_slice %122 {offsets = [0, 0], sizes = [2, 16], strides = [1, 1]} : vector<2x32xf32> to vector<2x16xf32>
    %124 = vector.extract_strided_slice %122 {offsets = [0, 16], sizes = [2, 16], strides = [1, 1]} : vector<2x32xf32> to vector<2x16xf32>
    %cst_28 = arith.constant dense<0.000000e+00> : vector<2x128xf32>
    %125 = tpu.matmul %121, %8, %cst_28 {dimension_numbers = #tpu.dot_dimension_numbers<[1], [0], [0], [1], [0, 0, 1, 1], [], []>} : vector<2x32xf32>, vector<32x128xf32>, vector<2x128xf32> -> vector<2x128xf32>
    %126 = vector.extract_strided_slice %7 {offsets = [2, 0, 0], sizes = [1, 2, 128], strides = [1, 1, 1]} : vector<8x2x128xf32> to vector<1x2x128xf32>
    %127 = vector.shape_cast %126 : vector<1x2x128xf32> to vector<2x128xf32>
    %128 = vector.extract_strided_slice %7 {offsets = [5, 0, 0], sizes = [1, 2, 128], strides = [1, 1, 1]} : vector<8x2x128xf32> to vector<1x2x128xf32>
    %129 = vector.shape_cast %128 : vector<1x2x128xf32> to vector<2x128xf32>
    %130 = arith.select %28, %127, %129 : vector<2x128xi1>, vector<2x128xf32>
    %131 = arith.addf %125, %130 : vector<2x128xf32>
    %132 = vector.extract_strided_slice %131 {offsets = [0, 0], sizes = [2, 32], strides = [1, 1]} : vector<2x128xf32> to vector<2x32xf32>
    %133 = arith.negf %132 : vector<2x32xf32>
    %134 = math.exp %133 : vector<2x32xf32>
    %cst_29 = arith.constant 1.000000e+00 : f32
    %135 = vector.broadcast %cst_29 : f32 to vector<2x32xf32>
    %136 = arith.addf %135, %134 : vector<2x32xf32>
    %137 = arith.divf %135, %136 : vector<2x32xf32>
    %138 = vector.extract_strided_slice %131 {offsets = [0, 32], sizes = [2, 32], strides = [1, 1]} : vector<2x128xf32> to vector<2x32xf32>
    %139 = arith.negf %138 : vector<2x32xf32>
    %140 = math.exp %139 : vector<2x32xf32>
    %cst_30 = arith.constant 1.000000e+00 : f32
    %141 = vector.broadcast %cst_30 : f32 to vector<2x32xf32>
    %142 = arith.addf %141, %140 : vector<2x32xf32>
    %143 = arith.divf %141, %142 : vector<2x32xf32>
    %144 = vector.extract_strided_slice %131 {offsets = [0, 64], sizes = [2, 32], strides = [1, 1]} : vector<2x128xf32> to vector<2x32xf32>
    %145 = math.tanh %144 : vector<2x32xf32>
    %146 = vector.extract_strided_slice %131 {offsets = [0, 96], sizes = [2, 32], strides = [1, 1]} : vector<2x128xf32> to vector<2x32xf32>
    %147 = arith.negf %146 : vector<2x32xf32>
    %148 = math.exp %147 : vector<2x32xf32>
    %cst_31 = arith.constant 1.000000e+00 : f32
    %149 = vector.broadcast %cst_31 : f32 to vector<2x32xf32>
    %150 = arith.addf %149, %148 : vector<2x32xf32>
    %151 = arith.divf %149, %150 : vector<2x32xf32>
    %152 = arith.mulf %143, %116 : vector<2x32xf32>
    %153 = arith.mulf %137, %145 : vector<2x32xf32>
    %154 = arith.addf %152, %153 : vector<2x32xf32>
    %155 = math.tanh %154 : vector<2x32xf32>
    %156 = arith.mulf %151, %155 : vector<2x32xf32>
    %157 = vector.extract_strided_slice %9 {offsets = [2, 0, 0], sizes = [1, 2, 32], strides = [1, 1, 1]} : vector<8x2x32xf32> to vector<1x2x32xf32>
    %158 = vector.shape_cast %157 : vector<1x2x32xf32> to vector<2x32xf32>
    %159 = arith.mulf %158, %154 : vector<2x32xf32>
    %cst_32 = arith.constant 1.000000e+00 : f32
    %160 = vector.broadcast %cst_32 : f32 to vector<2x32xf32>
    %161 = arith.subf %160, %158 : vector<2x32xf32>
    %162 = arith.mulf %161, %116 : vector<2x32xf32>
    %163 = arith.addf %159, %162 : vector<2x32xf32>
    %164 = arith.mulf %158, %156 : vector<2x32xf32>
    %cst_33 = arith.constant 1.000000e+00 : f32
    %165 = vector.broadcast %cst_33 : f32 to vector<2x32xf32>
    %166 = arith.subf %165, %158 : vector<2x32xf32>
    %167 = arith.mulf %166, %121 : vector<2x32xf32>
    %168 = arith.addf %164, %167 : vector<2x32xf32>
    %169 = arith.mulf %158, %156 : vector<2x32xf32>
    %170 = vector.extract_strided_slice %169 {offsets = [0, 0], sizes = [2, 16], strides = [1, 1]} : vector<2x32xf32> to vector<2x16xf32>
    %171 = vector.extract_strided_slice %169 {offsets = [0, 16], sizes = [2, 16], strides = [1, 1]} : vector<2x32xf32> to vector<2x16xf32>
    %cst_34 = arith.constant dense<0.000000e+00> : vector<2x128xf32>
    %172 = tpu.matmul %168, %8, %cst_34 {dimension_numbers = #tpu.dot_dimension_numbers<[1], [0], [0], [1], [0, 0, 1, 1], [], []>} : vector<2x32xf32>, vector<32x128xf32>, vector<2x128xf32> -> vector<2x128xf32>
    %173 = vector.extract_strided_slice %7 {offsets = [3, 0, 0], sizes = [1, 2, 128], strides = [1, 1, 1]} : vector<8x2x128xf32> to vector<1x2x128xf32>
    %174 = vector.shape_cast %173 : vector<1x2x128xf32> to vector<2x128xf32>
    %175 = vector.extract_strided_slice %7 {offsets = [4, 0, 0], sizes = [1, 2, 128], strides = [1, 1, 1]} : vector<8x2x128xf32> to vector<1x2x128xf32>
    %176 = vector.shape_cast %175 : vector<1x2x128xf32> to vector<2x128xf32>
    %177 = arith.select %28, %174, %176 : vector<2x128xi1>, vector<2x128xf32>
    %178 = arith.addf %172, %177 : vector<2x128xf32>
    %179 = vector.extract_strided_slice %178 {offsets = [0, 0], sizes = [2, 32], strides = [1, 1]} : vector<2x128xf32> to vector<2x32xf32>
    %180 = arith.negf %179 : vector<2x32xf32>
    %181 = math.exp %180 : vector<2x32xf32>
    %cst_35 = arith.constant 1.000000e+00 : f32
    %182 = vector.broadcast %cst_35 : f32 to vector<2x32xf32>
    %183 = arith.addf %182, %181 : vector<2x32xf32>
    %184 = arith.divf %182, %183 : vector<2x32xf32>
    %185 = vector.extract_strided_slice %178 {offsets = [0, 32], sizes = [2, 32], strides = [1, 1]} : vector<2x128xf32> to vector<2x32xf32>
    %186 = arith.negf %185 : vector<2x32xf32>
    %187 = math.exp %186 : vector<2x32xf32>
    %cst_36 = arith.constant 1.000000e+00 : f32
    %188 = vector.broadcast %cst_36 : f32 to vector<2x32xf32>
    %189 = arith.addf %188, %187 : vector<2x32xf32>
    %190 = arith.divf %188, %189 : vector<2x32xf32>
    %191 = vector.extract_strided_slice %178 {offsets = [0, 64], sizes = [2, 32], strides = [1, 1]} : vector<2x128xf32> to vector<2x32xf32>
    %192 = math.tanh %191 : vector<2x32xf32>
    %193 = vector.extract_strided_slice %178 {offsets = [0, 96], sizes = [2, 32], strides = [1, 1]} : vector<2x128xf32> to vector<2x32xf32>
    %194 = arith.negf %193 : vector<2x32xf32>
    %195 = math.exp %194 : vector<2x32xf32>
    %cst_37 = arith.constant 1.000000e+00 : f32
    %196 = vector.broadcast %cst_37 : f32 to vector<2x32xf32>
    %197 = arith.addf %196, %195 : vector<2x32xf32>
    %198 = arith.divf %196, %197 : vector<2x32xf32>
    %199 = arith.mulf %190, %163 : vector<2x32xf32>
    %200 = arith.mulf %184, %192 : vector<2x32xf32>
    %201 = arith.addf %199, %200 : vector<2x32xf32>
    %202 = math.tanh %201 : vector<2x32xf32>
    %203 = arith.mulf %198, %202 : vector<2x32xf32>
    %204 = vector.extract_strided_slice %9 {offsets = [3, 0, 0], sizes = [1, 2, 32], strides = [1, 1, 1]} : vector<8x2x32xf32> to vector<1x2x32xf32>
    %205 = vector.shape_cast %204 : vector<1x2x32xf32> to vector<2x32xf32>
    %206 = arith.mulf %205, %201 : vector<2x32xf32>
    %cst_38 = arith.constant 1.000000e+00 : f32
    %207 = vector.broadcast %cst_38 : f32 to vector<2x32xf32>
    %208 = arith.subf %207, %205 : vector<2x32xf32>
    %209 = arith.mulf %208, %163 : vector<2x32xf32>
    %210 = arith.addf %206, %209 : vector<2x32xf32>
    %211 = arith.mulf %205, %203 : vector<2x32xf32>
    %cst_39 = arith.constant 1.000000e+00 : f32
    %212 = vector.broadcast %cst_39 : f32 to vector<2x32xf32>
    %213 = arith.subf %212, %205 : vector<2x32xf32>
    %214 = arith.mulf %213, %168 : vector<2x32xf32>
    %215 = arith.addf %211, %214 : vector<2x32xf32>
    %216 = arith.mulf %205, %203 : vector<2x32xf32>
    %217 = vector.extract_strided_slice %216 {offsets = [0, 0], sizes = [2, 16], strides = [1, 1]} : vector<2x32xf32> to vector<2x16xf32>
    %218 = vector.extract_strided_slice %216 {offsets = [0, 16], sizes = [2, 16], strides = [1, 1]} : vector<2x32xf32> to vector<2x16xf32>
    %cst_40 = arith.constant dense<0.000000e+00> : vector<2x128xf32>
    %219 = tpu.matmul %215, %8, %cst_40 {dimension_numbers = #tpu.dot_dimension_numbers<[1], [0], [0], [1], [0, 0, 1, 1], [], []>} : vector<2x32xf32>, vector<32x128xf32>, vector<2x128xf32> -> vector<2x128xf32>
    %220 = vector.extract_strided_slice %7 {offsets = [4, 0, 0], sizes = [1, 2, 128], strides = [1, 1, 1]} : vector<8x2x128xf32> to vector<1x2x128xf32>
    %221 = vector.shape_cast %220 : vector<1x2x128xf32> to vector<2x128xf32>
    %222 = vector.extract_strided_slice %7 {offsets = [3, 0, 0], sizes = [1, 2, 128], strides = [1, 1, 1]} : vector<8x2x128xf32> to vector<1x2x128xf32>
    %223 = vector.shape_cast %222 : vector<1x2x128xf32> to vector<2x128xf32>
    %224 = arith.select %28, %221, %223 : vector<2x128xi1>, vector<2x128xf32>
    %225 = arith.addf %219, %224 : vector<2x128xf32>
    %226 = vector.extract_strided_slice %225 {offsets = [0, 0], sizes = [2, 32], strides = [1, 1]} : vector<2x128xf32> to vector<2x32xf32>
    %227 = arith.negf %226 : vector<2x32xf32>
    %228 = math.exp %227 : vector<2x32xf32>
    %cst_41 = arith.constant 1.000000e+00 : f32
    %229 = vector.broadcast %cst_41 : f32 to vector<2x32xf32>
    %230 = arith.addf %229, %228 : vector<2x32xf32>
    %231 = arith.divf %229, %230 : vector<2x32xf32>
    %232 = vector.extract_strided_slice %225 {offsets = [0, 32], sizes = [2, 32], strides = [1, 1]} : vector<2x128xf32> to vector<2x32xf32>
    %233 = arith.negf %232 : vector<2x32xf32>
    %234 = math.exp %233 : vector<2x32xf32>
    %cst_42 = arith.constant 1.000000e+00 : f32
    %235 = vector.broadcast %cst_42 : f32 to vector<2x32xf32>
    %236 = arith.addf %235, %234 : vector<2x32xf32>
    %237 = arith.divf %235, %236 : vector<2x32xf32>
    %238 = vector.extract_strided_slice %225 {offsets = [0, 64], sizes = [2, 32], strides = [1, 1]} : vector<2x128xf32> to vector<2x32xf32>
    %239 = math.tanh %238 : vector<2x32xf32>
    %240 = vector.extract_strided_slice %225 {offsets = [0, 96], sizes = [2, 32], strides = [1, 1]} : vector<2x128xf32> to vector<2x32xf32>
    %241 = arith.negf %240 : vector<2x32xf32>
    %242 = math.exp %241 : vector<2x32xf32>
    %cst_43 = arith.constant 1.000000e+00 : f32
    %243 = vector.broadcast %cst_43 : f32 to vector<2x32xf32>
    %244 = arith.addf %243, %242 : vector<2x32xf32>
    %245 = arith.divf %243, %244 : vector<2x32xf32>
    %246 = arith.mulf %237, %210 : vector<2x32xf32>
    %247 = arith.mulf %231, %239 : vector<2x32xf32>
    %248 = arith.addf %246, %247 : vector<2x32xf32>
    %249 = math.tanh %248 : vector<2x32xf32>
    %250 = arith.mulf %245, %249 : vector<2x32xf32>
    %251 = vector.extract_strided_slice %9 {offsets = [4, 0, 0], sizes = [1, 2, 32], strides = [1, 1, 1]} : vector<8x2x32xf32> to vector<1x2x32xf32>
    %252 = vector.shape_cast %251 : vector<1x2x32xf32> to vector<2x32xf32>
    %253 = arith.mulf %252, %248 : vector<2x32xf32>
    %cst_44 = arith.constant 1.000000e+00 : f32
    %254 = vector.broadcast %cst_44 : f32 to vector<2x32xf32>
    %255 = arith.subf %254, %252 : vector<2x32xf32>
    %256 = arith.mulf %255, %210 : vector<2x32xf32>
    %257 = arith.addf %253, %256 : vector<2x32xf32>
    %258 = arith.mulf %252, %250 : vector<2x32xf32>
    %cst_45 = arith.constant 1.000000e+00 : f32
    %259 = vector.broadcast %cst_45 : f32 to vector<2x32xf32>
    %260 = arith.subf %259, %252 : vector<2x32xf32>
    %261 = arith.mulf %260, %215 : vector<2x32xf32>
    %262 = arith.addf %258, %261 : vector<2x32xf32>
    %263 = arith.mulf %252, %250 : vector<2x32xf32>
    %264 = vector.extract_strided_slice %263 {offsets = [0, 0], sizes = [2, 16], strides = [1, 1]} : vector<2x32xf32> to vector<2x16xf32>
    %265 = vector.extract_strided_slice %263 {offsets = [0, 16], sizes = [2, 16], strides = [1, 1]} : vector<2x32xf32> to vector<2x16xf32>
    %cst_46 = arith.constant dense<0.000000e+00> : vector<2x128xf32>
    %266 = tpu.matmul %262, %8, %cst_46 {dimension_numbers = #tpu.dot_dimension_numbers<[1], [0], [0], [1], [0, 0, 1, 1], [], []>} : vector<2x32xf32>, vector<32x128xf32>, vector<2x128xf32> -> vector<2x128xf32>
    %267 = vector.extract_strided_slice %7 {offsets = [5, 0, 0], sizes = [1, 2, 128], strides = [1, 1, 1]} : vector<8x2x128xf32> to vector<1x2x128xf32>
    %268 = vector.shape_cast %267 : vector<1x2x128xf32> to vector<2x128xf32>
    %269 = vector.extract_strided_slice %7 {offsets = [2, 0, 0], sizes = [1, 2, 128], strides = [1, 1, 1]} : vector<8x2x128xf32> to vector<1x2x128xf32>
    %270 = vector.shape_cast %269 : vector<1x2x128xf32> to vector<2x128xf32>
    %271 = arith.select %28, %268, %270 : vector<2x128xi1>, vector<2x128xf32>
    %272 = arith.addf %266, %271 : vector<2x128xf32>
    %273 = vector.extract_strided_slice %272 {offsets = [0, 0], sizes = [2, 32], strides = [1, 1]} : vector<2x128xf32> to vector<2x32xf32>
    %274 = arith.negf %273 : vector<2x32xf32>
    %275 = math.exp %274 : vector<2x32xf32>
    %cst_47 = arith.constant 1.000000e+00 : f32
    %276 = vector.broadcast %cst_47 : f32 to vector<2x32xf32>
    %277 = arith.addf %276, %275 : vector<2x32xf32>
    %278 = arith.divf %276, %277 : vector<2x32xf32>
    %279 = vector.extract_strided_slice %272 {offsets = [0, 32], sizes = [2, 32], strides = [1, 1]} : vector<2x128xf32> to vector<2x32xf32>
    %280 = arith.negf %279 : vector<2x32xf32>
    %281 = math.exp %280 : vector<2x32xf32>
    %cst_48 = arith.constant 1.000000e+00 : f32
    %282 = vector.broadcast %cst_48 : f32 to vector<2x32xf32>
    %283 = arith.addf %282, %281 : vector<2x32xf32>
    %284 = arith.divf %282, %283 : vector<2x32xf32>
    %285 = vector.extract_strided_slice %272 {offsets = [0, 64], sizes = [2, 32], strides = [1, 1]} : vector<2x128xf32> to vector<2x32xf32>
    %286 = math.tanh %285 : vector<2x32xf32>
    %287 = vector.extract_strided_slice %272 {offsets = [0, 96], sizes = [2, 32], strides = [1, 1]} : vector<2x128xf32> to vector<2x32xf32>
    %288 = arith.negf %287 : vector<2x32xf32>
    %289 = math.exp %288 : vector<2x32xf32>
    %cst_49 = arith.constant 1.000000e+00 : f32
    %290 = vector.broadcast %cst_49 : f32 to vector<2x32xf32>
    %291 = arith.addf %290, %289 : vector<2x32xf32>
    %292 = arith.divf %290, %291 : vector<2x32xf32>
    %293 = arith.mulf %284, %257 : vector<2x32xf32>
    %294 = arith.mulf %278, %286 : vector<2x32xf32>
    %295 = arith.addf %293, %294 : vector<2x32xf32>
    %296 = math.tanh %295 : vector<2x32xf32>
    %297 = arith.mulf %292, %296 : vector<2x32xf32>
    %298 = vector.extract_strided_slice %9 {offsets = [5, 0, 0], sizes = [1, 2, 32], strides = [1, 1, 1]} : vector<8x2x32xf32> to vector<1x2x32xf32>
    %299 = vector.shape_cast %298 : vector<1x2x32xf32> to vector<2x32xf32>
    %300 = arith.mulf %299, %295 : vector<2x32xf32>
    %cst_50 = arith.constant 1.000000e+00 : f32
    %301 = vector.broadcast %cst_50 : f32 to vector<2x32xf32>
    %302 = arith.subf %301, %299 : vector<2x32xf32>
    %303 = arith.mulf %302, %257 : vector<2x32xf32>
    %304 = arith.addf %300, %303 : vector<2x32xf32>
    %305 = arith.mulf %299, %297 : vector<2x32xf32>
    %cst_51 = arith.constant 1.000000e+00 : f32
    %306 = vector.broadcast %cst_51 : f32 to vector<2x32xf32>
    %307 = arith.subf %306, %299 : vector<2x32xf32>
    %308 = arith.mulf %307, %262 : vector<2x32xf32>
    %309 = arith.addf %305, %308 : vector<2x32xf32>
    %310 = arith.mulf %299, %297 : vector<2x32xf32>
    %311 = vector.extract_strided_slice %310 {offsets = [0, 0], sizes = [2, 16], strides = [1, 1]} : vector<2x32xf32> to vector<2x16xf32>
    %312 = vector.extract_strided_slice %310 {offsets = [0, 16], sizes = [2, 16], strides = [1, 1]} : vector<2x32xf32> to vector<2x16xf32>
    %cst_52 = arith.constant dense<0.000000e+00> : vector<2x128xf32>
    %313 = tpu.matmul %309, %8, %cst_52 {dimension_numbers = #tpu.dot_dimension_numbers<[1], [0], [0], [1], [0, 0, 1, 1], [], []>} : vector<2x32xf32>, vector<32x128xf32>, vector<2x128xf32> -> vector<2x128xf32>
    %314 = vector.extract_strided_slice %7 {offsets = [6, 0, 0], sizes = [1, 2, 128], strides = [1, 1, 1]} : vector<8x2x128xf32> to vector<1x2x128xf32>
    %315 = vector.shape_cast %314 : vector<1x2x128xf32> to vector<2x128xf32>
    %316 = vector.extract_strided_slice %7 {offsets = [1, 0, 0], sizes = [1, 2, 128], strides = [1, 1, 1]} : vector<8x2x128xf32> to vector<1x2x128xf32>
    %317 = vector.shape_cast %316 : vector<1x2x128xf32> to vector<2x128xf32>
    %318 = arith.select %28, %315, %317 : vector<2x128xi1>, vector<2x128xf32>
    %319 = arith.addf %313, %318 : vector<2x128xf32>
    %320 = vector.extract_strided_slice %319 {offsets = [0, 0], sizes = [2, 32], strides = [1, 1]} : vector<2x128xf32> to vector<2x32xf32>
    %321 = arith.negf %320 : vector<2x32xf32>
    %322 = math.exp %321 : vector<2x32xf32>
    %cst_53 = arith.constant 1.000000e+00 : f32
    %323 = vector.broadcast %cst_53 : f32 to vector<2x32xf32>
    %324 = arith.addf %323, %322 : vector<2x32xf32>
    %325 = arith.divf %323, %324 : vector<2x32xf32>
    %326 = vector.extract_strided_slice %319 {offsets = [0, 32], sizes = [2, 32], strides = [1, 1]} : vector<2x128xf32> to vector<2x32xf32>
    %327 = arith.negf %326 : vector<2x32xf32>
    %328 = math.exp %327 : vector<2x32xf32>
    %cst_54 = arith.constant 1.000000e+00 : f32
    %329 = vector.broadcast %cst_54 : f32 to vector<2x32xf32>
    %330 = arith.addf %329, %328 : vector<2x32xf32>
    %331 = arith.divf %329, %330 : vector<2x32xf32>
    %332 = vector.extract_strided_slice %319 {offsets = [0, 64], sizes = [2, 32], strides = [1, 1]} : vector<2x128xf32> to vector<2x32xf32>
    %333 = math.tanh %332 : vector<2x32xf32>
    %334 = vector.extract_strided_slice %319 {offsets = [0, 96], sizes = [2, 32], strides = [1, 1]} : vector<2x128xf32> to vector<2x32xf32>
    %335 = arith.negf %334 : vector<2x32xf32>
    %336 = math.exp %335 : vector<2x32xf32>
    %cst_55 = arith.constant 1.000000e+00 : f32
    %337 = vector.broadcast %cst_55 : f32 to vector<2x32xf32>
    %338 = arith.addf %337, %336 : vector<2x32xf32>
    %339 = arith.divf %337, %338 : vector<2x32xf32>
    %340 = arith.mulf %331, %304 : vector<2x32xf32>
    %341 = arith.mulf %325, %333 : vector<2x32xf32>
    %342 = arith.addf %340, %341 : vector<2x32xf32>
    %343 = math.tanh %342 : vector<2x32xf32>
    %344 = arith.mulf %339, %343 : vector<2x32xf32>
    %345 = vector.extract_strided_slice %9 {offsets = [6, 0, 0], sizes = [1, 2, 32], strides = [1, 1, 1]} : vector<8x2x32xf32> to vector<1x2x32xf32>
    %346 = vector.shape_cast %345 : vector<1x2x32xf32> to vector<2x32xf32>
    %347 = arith.mulf %346, %342 : vector<2x32xf32>
    %cst_56 = arith.constant 1.000000e+00 : f32
    %348 = vector.broadcast %cst_56 : f32 to vector<2x32xf32>
    %349 = arith.subf %348, %346 : vector<2x32xf32>
    %350 = arith.mulf %349, %304 : vector<2x32xf32>
    %351 = arith.addf %347, %350 : vector<2x32xf32>
    %352 = arith.mulf %346, %344 : vector<2x32xf32>
    %cst_57 = arith.constant 1.000000e+00 : f32
    %353 = vector.broadcast %cst_57 : f32 to vector<2x32xf32>
    %354 = arith.subf %353, %346 : vector<2x32xf32>
    %355 = arith.mulf %354, %309 : vector<2x32xf32>
    %356 = arith.addf %352, %355 : vector<2x32xf32>
    %357 = arith.mulf %346, %344 : vector<2x32xf32>
    %358 = vector.extract_strided_slice %357 {offsets = [0, 0], sizes = [2, 16], strides = [1, 1]} : vector<2x32xf32> to vector<2x16xf32>
    %359 = vector.extract_strided_slice %357 {offsets = [0, 16], sizes = [2, 16], strides = [1, 1]} : vector<2x32xf32> to vector<2x16xf32>
    %cst_58 = arith.constant dense<0.000000e+00> : vector<2x128xf32>
    %360 = tpu.matmul %356, %8, %cst_58 {dimension_numbers = #tpu.dot_dimension_numbers<[1], [0], [0], [1], [0, 0, 1, 1], [], []>} : vector<2x32xf32>, vector<32x128xf32>, vector<2x128xf32> -> vector<2x128xf32>
    %361 = vector.extract_strided_slice %7 {offsets = [7, 0, 0], sizes = [1, 2, 128], strides = [1, 1, 1]} : vector<8x2x128xf32> to vector<1x2x128xf32>
    %362 = vector.shape_cast %361 : vector<1x2x128xf32> to vector<2x128xf32>
    %363 = vector.extract_strided_slice %7 {offsets = [0, 0, 0], sizes = [1, 2, 128], strides = [1, 1, 1]} : vector<8x2x128xf32> to vector<1x2x128xf32>
    %364 = vector.shape_cast %363 : vector<1x2x128xf32> to vector<2x128xf32>
    %365 = arith.select %28, %362, %364 : vector<2x128xi1>, vector<2x128xf32>
    %366 = arith.addf %360, %365 : vector<2x128xf32>
    %367 = vector.extract_strided_slice %366 {offsets = [0, 0], sizes = [2, 32], strides = [1, 1]} : vector<2x128xf32> to vector<2x32xf32>
    %368 = arith.negf %367 : vector<2x32xf32>
    %369 = math.exp %368 : vector<2x32xf32>
    %cst_59 = arith.constant 1.000000e+00 : f32
    %370 = vector.broadcast %cst_59 : f32 to vector<2x32xf32>
    %371 = arith.addf %370, %369 : vector<2x32xf32>
    %372 = arith.divf %370, %371 : vector<2x32xf32>
    %373 = vector.extract_strided_slice %366 {offsets = [0, 32], sizes = [2, 32], strides = [1, 1]} : vector<2x128xf32> to vector<2x32xf32>
    %374 = arith.negf %373 : vector<2x32xf32>
    %375 = math.exp %374 : vector<2x32xf32>
    %cst_60 = arith.constant 1.000000e+00 : f32
    %376 = vector.broadcast %cst_60 : f32 to vector<2x32xf32>
    %377 = arith.addf %376, %375 : vector<2x32xf32>
    %378 = arith.divf %376, %377 : vector<2x32xf32>
    %379 = vector.extract_strided_slice %366 {offsets = [0, 64], sizes = [2, 32], strides = [1, 1]} : vector<2x128xf32> to vector<2x32xf32>
    %380 = math.tanh %379 : vector<2x32xf32>
    %381 = vector.extract_strided_slice %366 {offsets = [0, 96], sizes = [2, 32], strides = [1, 1]} : vector<2x128xf32> to vector<2x32xf32>
    %382 = arith.negf %381 : vector<2x32xf32>
    %383 = math.exp %382 : vector<2x32xf32>
    %cst_61 = arith.constant 1.000000e+00 : f32
    %384 = vector.broadcast %cst_61 : f32 to vector<2x32xf32>
    %385 = arith.addf %384, %383 : vector<2x32xf32>
    %386 = arith.divf %384, %385 : vector<2x32xf32>
    %387 = arith.mulf %378, %351 : vector<2x32xf32>
    %388 = arith.mulf %372, %380 : vector<2x32xf32>
    %389 = arith.addf %387, %388 : vector<2x32xf32>
    %390 = math.tanh %389 : vector<2x32xf32>
    %391 = arith.mulf %386, %390 : vector<2x32xf32>
    %392 = vector.extract_strided_slice %9 {offsets = [7, 0, 0], sizes = [1, 2, 32], strides = [1, 1, 1]} : vector<8x2x32xf32> to vector<1x2x32xf32>
    %393 = vector.shape_cast %392 : vector<1x2x32xf32> to vector<2x32xf32>
    %394 = arith.mulf %393, %391 : vector<2x32xf32>
    %395 = vector.extract_strided_slice %394 {offsets = [0, 0], sizes = [2, 16], strides = [1, 1]} : vector<2x32xf32> to vector<2x16xf32>
    %396 = vector.extract_strided_slice %394 {offsets = [0, 16], sizes = [2, 16], strides = [1, 1]} : vector<2x32xf32> to vector<2x16xf32>
    %397 = tpu.concatenate %76, %123, %170, %217, %264, %311, %358, %395 in 0 : vector<2x16xf32>, vector<2x16xf32>, vector<2x16xf32>, vector<2x16xf32>, vector<2x16xf32>, vector<2x16xf32>, vector<2x16xf32>, vector<2x16xf32> -> vector<16x16xf32>
    %398 = tpu.concatenate %396, %359, %312, %265, %218, %171, %124, %77 in 0 : vector<2x16xf32>, vector<2x16xf32>, vector<2x16xf32>, vector<2x16xf32>, vector<2x16xf32>, vector<2x16xf32>, vector<2x16xf32>, vector<2x16xf32> -> vector<16x16xf32>
    %c0_62 = arith.constant 0 : index
    %c0_63 = arith.constant 0 : index
    %399 = vector.load %arg6[%c0_62, %c0_63] : memref<32x128xf32, #tpu.memory_space<vmem>>, vector<16x128xf32>
    %cst_64 = arith.constant dense<0.000000e+00> : vector<16x128xf32>
    %400 = tpu.matmul %397, %399, %cst_64 {dimension_numbers = #tpu.dot_dimension_numbers<[1], [0], [0], [1], [0, 0, 1, 1], [], []>} : vector<16x16xf32>, vector<16x128xf32>, vector<16x128xf32> -> vector<16x128xf32>
    %c16 = arith.constant 16 : index
    %c0_65 = arith.constant 0 : index
    %401 = vector.load %arg6[%c16, %c0_65] : memref<32x128xf32, #tpu.memory_space<vmem>>, vector<16x128xf32>
    %cst_66 = arith.constant dense<0.000000e+00> : vector<16x128xf32>
    %402 = tpu.matmul %398, %401, %cst_66 {dimension_numbers = #tpu.dot_dimension_numbers<[1], [0], [0], [1], [0, 0, 1, 1], [], []>} : vector<16x16xf32>, vector<16x128xf32>, vector<16x128xf32> -> vector<16x128xf32>
    %403 = arith.addf %400, %402 : vector<16x128xf32>
    %c0_67 = arith.constant 0 : index
    %c0_68 = arith.constant 0 : index
    %404 = vector.load %arg7[%c0_67, %c0_68] : memref<1x128xf32, #tpu.memory_space<vmem>>, vector<1x128xf32>
    %405 = vector.broadcast %404 : vector<1x128xf32> to vector<16x128xf32>
    %406 = arith.addf %403, %405 : vector<16x128xf32>
    %c0_69 = arith.constant 0 : index
    %c0_70 = arith.constant 0 : index
    %407 = vector.load %arg8[%c0_69, %c0_70] : memref<16x128xf32, #tpu.memory_space<vmem>>, vector<16x128xf32>
    tpu.vector_store %arg8[%c0_69, %c0_70], %406 {strides = array<i32>} : memref<16x128xf32, #tpu.memory_space<vmem>>, vector<16x128xf32>,
    return
  }
  func.func @transform_0(%arg0: i32) -> (i32, i32, i32) {
    %c0_i32 = arith.constant 0 : i32
    %c0_i32_0 = arith.constant 0 : i32
    %c0_i32_1 = arith.constant 0 : i32
    %c0_i32_2 = arith.constant 0 : i32
    return %c0_i32, %c0_i32_0, %c0_i32_1 : i32, i32, i32
  }
  func.func @transform_1(%arg0: i32) -> (i32, i32, i32) {
    %c0_i32 = arith.constant 0 : i32
    %c0_i32_0 = arith.constant 0 : i32
    %c0_i32_1 = arith.constant 0 : i32
    %c0_i32_2 = arith.constant 0 : i32
    return %c0_i32, %c0_i32_0, %c0_i32_1 : i32, i32, i32
  }
  func.func @transform_2(%arg0: i32) -> (i32, i32) {
    %c0_i32 = arith.constant 0 : i32
    %c0_i32_0 = arith.constant 0 : i32
    %c0_i32_1 = arith.constant 0 : i32
    return %c0_i32, %c0_i32_0 : i32, i32
  }
  func.func @transform_3(%arg0: i32) -> (i32, i32) {
    %c0_i32 = arith.constant 0 : i32
    %c0_i32_0 = arith.constant 0 : i32
    %c0_i32_1 = arith.constant 0 : i32
    return %c0_i32, %c0_i32_0 : i32, i32
  }
  func.func @transform_4(%arg0: i32) -> (i32, i32) {
    %c0_i32 = arith.constant 0 : i32
    %c0_i32_0 = arith.constant 0 : i32
    %c0_i32_1 = arith.constant 0 : i32
    return %c0_i32, %c0_i32_0 : i32, i32
  }
  func.func @transform_5(%arg0: i32) -> (i32, i32) {
    %c0_i32 = arith.constant 0 : i32
    %c0_i32_0 = arith.constant 0 : i32
    %c0_i32_1 = arith.constant 0 : i32
    return %c0_i32, %c0_i32_0 : i32, i32
  }
  func.func @transform_6(%arg0: i32) -> (i32, i32) {
    %c0_i32 = arith.constant 0 : i32
    %c0_i32_0 = arith.constant 0 : i32
    %c0_i32_1 = arith.constant 0 : i32
    return %c0_i32, %c0_i32_0 : i32, i32
  }
  func.func @transform_7(%arg0: i32) -> (i32, i32) {
    %c0_i32 = arith.constant 0 : i32
    %c0_i32_0 = arith.constant 0 : i32
    %c0_i32_1 = arith.constant 0 : i32
    return %c0_i32, %c0_i32_0 : i32, i32
  }
}

</mosaic_0001>

<bundles_post_ra>
// kernel: student_forward.1
= control target key start
LH: loop header
LB: loop body
LE: loop exit
PB: predicated region body
PF: predicated region fallthrough
CT: control target
= control target key end

     0   :  { %v70_v0 = vlaneseq  ;;  %v1697_v3 = vmov 1983009808   ;;  %v1698_v5 = vmov 0.0   ;;  %vm1699_vm0 = vmmov 0   ;;  %s1701_s10 = smov 32   ;;  %s1702_s11 = smov 96   ;;  %s2162_s2 = inlined_call_operand.vmem [shape: f32[128,128], index: 2, kind: input, shape index: {}]   ;;  %s2163_s0 = inlined_call_operand.vmem [shape: f32[8,2,128], index: 0, kind: input, shape index: {}]   ;;  %s2164_s4 = inlined_call_operand.vmem [shape: f32[32,128], index: 4, kind: input, shape index: {}]   ;;  %s2165_s3 = inlined_call_operand.vmem [shape: f32[1,128], index: 3, kind: input, shape index: {}]   ;;  %s2166_s1 = inlined_call_operand.vmem [shape: f32[8,2,32], index: 1, kind: input, shape index: {}]   ;;  %s2167_s5 = inlined_call_operand.vmem [shape: f32[32,128], index: 5, kind: input, shape index: {}]   ;;  %s2168_s6 = inlined_call_operand.vmem [shape: f32[1,128], index: 6, kind: input, shape index: {}]   ;;  %s2169_s7 = inlined_call_operand.vmem [shape: f32[16,128], index: 7, kind: output, shape index: {}]  }
   0x1   :  { %v49_v1 = vld [vmem:[%s2162_s2 + $0x78] sm:$0xff]  ;;  %v48_v2 = vld [vmem:[%s2162_s2 + $0x70] sm:$0xff]  ;;  %v68_v4 = vunpack.c.l.s4 %v1697_v3  ;;  %1524 = vmatprep.subr.mxu1 %v1698_v5  ;;  %1532 = vmatprep.mubr.msk.f32.mxu1 %vm1699_vm0, %v1698_v5  ;;  %v47_v7 = vld [vmem:[%s2162_s2 + $0x68] sm:$0xff]  ;;  %vm248_vm2 = vcmask 261120   ;;  %vm1187_vm3 = vcmask 1041408   ;;  %vm1189_vm4 = vcmask 1043456  }
   0x2   :  { %1489 = vmatprep.subr.mxu0 %v49_v1  ;;  %v71_v6 = vshrl.u32 %v70_v0, 7  ;;  %v46_v9 = vld [vmem:[%s2162_s2 + $0x60] sm:$0xff]  ;;  %v45_v13 = vld [vmem:[%s2162_s2 + $0x58] sm:$0xff]  ;;  %v44_v18 = vld [vmem:[%s2162_s2 + $0x50] sm:$0xff]  ;;  %v233_v48 = vand.u32 127, %v70_v0  ;;  %vm1191_vm5 = vcmask 1045504  }
   0x3   :  { %1490 = vmatpush3.msra.mxu0 %v49_v1  ;;  %v69_v8 = vunpack.c.0.s8 %v68_v4  ;;  %v26_v11 = vld [vmem:[%s2163_s0] sm:$0x3]  ;;  %v27_v12 = vld [vmem:[%s2163_s0 + $0x2] sm:$0x3]  ;;  %v28_v14 = vld [vmem:[%s2163_s0 + $0x4] sm:$0x3] }
   0x4   :  { %1491 = vmatprep.subr.mxu0 %v48_v2  ;;  %v29_v15 = vld [vmem:[%s2163_s0 + $0x6] sm:$0x3]  ;;  %v65_v16 = vcombine.low %v26_v11, %v27_v12  ;;  %v1784_v20 = vld [vmem:[%s2164_s4 + $0x18] sm:$0xff]  ;;  %v1789_v21 = vld [vmem:[%s2164_s4 + $0x10] sm:$0xff]  ;;  %v238_v52 = vand.u32 31, %v233_v48  ;;  %vm1226_vm6 = vcmask 130048  }
   0x5   :  { %1492 = vmatpush3.msra.mxu0 %v48_v2  ;;  %v1760_v10 = vsub.s32 %v69_v8, %v71_v6  ;;  %v66_v17 = vcombine.low %v28_v14, %v29_v15  ;;  %1525 = vmatpush3.msra.mxu1 %v1784_v20  ;;  %v43_v23 = vld [vmem:[%s2162_s2 + $0x48] sm:$0xff]  ;;  %v42_v26 = vld [vmem:[%s2162_s2 + $0x40] sm:$0xff]  ;;  %v41_v28 = vld [vmem:[%s2162_s2 + $0x38] sm:$0xff] }
   0x6   :  { %1493 = vmatprep.subr.mxu0 %v47_v7  ;;  %1526 = vmatprep.subr.mxu1 %v1698_v5  ;;  %v1801_v25 = vld [vmem:[%s2164_s4 + $0x8] sm:$0xff]  ;;  %v1810_v27 = vld [vmem:[%s2164_s4] sm:$0xff]  ;;  %v40_v29 = vld [vmem:[%s2162_s2 + $0x30] sm:$0xff]  ;;  %vm1889_vm1 = vcmp.lt.s32.totalorder %v238_v52, 16 }
   0x7   :  { %1494 = vmatpush3.msra.mxu0 %v47_v7  ;;  %v73_v19 = vrot.slane %v65_v16, %v1760_v10  ;;  %v80_v22 = vrot.slane %v66_v17, %v1760_v10  ;;  %1527 = vmatpush3.msra.mxu1 %v1789_v21  ;;  %v39_v30 = vld [vmem:[%s2162_s2 + $0x28] sm:$0xff]  ;;  %v38_v35 = vld [vmem:[%s2162_s2 + $0x20] sm:$0xff]  ;;  %v37_v38 = vld [vmem:[%s2162_s2 + $0x18] sm:$0xff] }
   0x8   :  { %1495 = vmatprep.subr.mxu0 %v46_v9  ;;  %1528 = vmatprep.subr.mxu1 %v1698_v5  ;;  %v30_v31 = vld [vmem:[%s2163_s0 + $0x8] sm:$0x3]  ;;  %v31_v32 = vld [vmem:[%s2163_s0 + $0xa] sm:$0x3]  ;;  %v32_v33 = vld [vmem:[%s2163_s0 + $0xc] sm:$0x3] }
   0x9   :  { %1496 = vmatpush3.msra.mxu0 %v46_v9  ;;  %v81_v24 = vcombine.low %v73_v19, %v80_v22  ;;  %1529 = vmatpush3.msra.mxu1 %v1801_v25  ;;  %v33_v34 = vld [vmem:[%s2163_s0 + $0xe] sm:$0x3]  ;;  %v82_v36 = vcombine.low %v30_v31, %v31_v32  ;;  %v36_v39 = vld [vmem:[%s2162_s2 + $0x10] sm:$0xff]  ;;  %v34_v43 = vld [vmem:[%s2162_s2] sm:$0xff] }
   0xa   :  { %1497 = vmatprep.subr.mxu0 %v45_v13  ;;  %1530 = vmatprep.subr.mxu1 %v1698_v5  ;;  %v83_v37 = vcombine.low %v32_v33, %v33_v34  ;;  %v35_v42 = vld [vmem:[%s2162_s2 + $0x8] sm:$0xff]  ;;  %v1402_v47 = vld [vmem:[%s2165_s3] ss:$0 sm:$0xff]  ;;  %s1700_s3 = smov 64   ;;  %v225_v52 = vld [vmem:[%s2166_s1 + $0x2] sm:$0x3] }
   0xb   :  { %1498 = vmatpush3.msra.mxu0 %v45_v13  ;;  %1521 = vmatprep.mubr.f32.mxu0 %v81_v24  ;;  %v90_v40 = vrot.slane %v82_v36, %v1760_v10  ;;  %v224_v24 = vld [vmem:[%s2166_s1] sm:$0x3]  ;;  %s1703_s2 = smov 112  }
   0xc   :  { %1499 = vmatprep.subr.mxu0 %v44_v18  ;;  %1531 = vmatpush3.msra.mxu1 %v1810_v27  ;;  %v97_v41 = vrot.slane %v83_v37, %v1760_v10 }
   0xd   :  { %1500 = vmatpush3.msra.mxu0 %v44_v18  ;;  %1533 = vmatmul.mubr.f32.vlgmr.msra.gmra.mxu1 %v1698_v5 }
   0xe   :  { %1501 = vmatprep.subr.mxu0 %v43_v23  ;;  %1535 = vmatprep.subr.mxu1 %v1698_v5  ;;  %v98_v44 = vcombine.low %v90_v40, %v97_v41 }
   0xf   :  { %1502 = vmatpush3.msra.mxu0 %v43_v23  ;;  %1536 = vmatpush3.msra.mxu1 %v1784_v20 }
  0x10   :  { %1503 = vmatprep.subr.mxu0 %v42_v26  ;;  %1537 = vmatprep.subr.mxu1 %v1698_v5 }
  0x11   :  { %1504 = vmatpush3.msra.mxu0 %v42_v26  ;;  %1538 = vmatpush3.msra.mxu1 %v1789_v21  ;;  %v351_v26 = vsub.f32 1.0, %v224_v24 }
  0x12   :  { %1505 = vmatprep.subr.mxu0 %v41_v28  ;;  %1539 = vmatprep.subr.mxu1 %v1698_v5 }
  0x13   :  { %1506 = vmatpush3.msra.mxu0 %v41_v28  ;;  %1540 = vmatpush3.msra.mxu1 %v1801_v25  ;;  %v352_v28 = vmul.f32 0.0, %v351_v26 }
  0x14   :  { %1507 = vmatprep.subr.mxu0 %v40_v29  ;;  %1541 = vmatprep.subr.mxu1 %v1698_v5 }
  0x15   :  { %1508 = vmatpush3.msra.mxu0 %v40_v29  ;;  %1542 = vmatpush3.msra.mxu1 %v1810_v27 }
  0x16   :  { %1509 = vmatprep.subr.mxu0 %v39_v30  ;;  %1543 = vmatprep.mubr.msk.f32.mxu1 %vm1699_vm0, %v1698_v5 }
  0x17   :  { %1510 = vmatpush3.msra.mxu0 %v39_v30  ;;  %1546 = vmatprep.subr.mxu1 %v1698_v5 }
  0x18   :  { %1511 = vmatprep.subr.mxu0 %v38_v35 }
  0x19   :  { %1512 = vmatpush3.msra.mxu0 %v38_v35 }
  0x1a   :  { %1513 = vmatprep.subr.mxu0 %v37_v38 }
  0x1b   :  { %1514 = vmatpush3.msra.mxu0 %v37_v38 }
  0x1c   :  { %1515 = vmatprep.subr.mxu0 %v36_v39 }
  0x1d   :  { %1516 = vmatpush3.msra.mxu0 %v36_v39 }
  0x1e   :  { %1517 = vmatprep.subr.mxu0 %v35_v42 }
  0x1f   :  { %1518 = vmatpush3.msra.mxu0 %v35_v42 }
  0x20   :  { %1519 = vmatprep.subr.mxu0 %v34_v43 }
  0x21   :  { %1520 = vmatpush3.msra.mxu0 %v34_v43 }
  0x22   :  { %1522 = vmatmul.mubr.f32.vlgmr.msra.gmra.mxu0 %v98_v44  ;;  %1568 = vmatprep.subr.mxu0 %v1698_v5 }
  0x23   :  { %1569 = vmatpush3.msra.mxu0 %v1784_v20  ;;  %1576 = vmatprep.mubr.msk.f32.mxu0 %vm1699_vm0, %v1698_v5 }
  0x24   :  { %1570 = vmatprep.subr.mxu0 %v1698_v5 }
  0x25   :  { %1571 = vmatpush3.msra.mxu0 %v1789_v21 }
  0x26   :  { %1572 = vmatprep.subr.mxu0 %v1698_v5 }
  0x27   :  { %1573 = vmatpush3.msra.mxu0 %v1801_v25 }
  0x28   :  { %1574 = vmatprep.subr.mxu0 %v1698_v5 }
  0x29   :  { %1575 = vmatpush3.msra.mxu0 %v1810_v27 }
  0x2a   :  { %1590 = vmatprep.subr.mxu0 %v1698_v5 }
  0xcd   :  { %v318_v45 = vpop.f32.mrf.mxu1 }
  0xcf   :  { %v1534_v46 = vpop.f32.mrf.mxu1 }
  0xe2   :  { %v1523_v49 = vpop.f32.mrf.mxu0 }
  0xe3   :  { %v173_v50 = vadd.f32 %v1523_v49, %v1402_v47 }
  0xe4   :  { %v167_v51 = vpop.f32.mrf.mxu0 }
  0xe5   :  { %v195_v53 = vcombine.high %v173_v50, %v173_v50  ;;  %v1881_v54 = vrot.slane %v173_v50, %v1760_v10  ;;  %v168_v55 = vadd.f32 %v1402_v47, %v167_v51 }
  0xe7   :  { %v1884_v56 = vrot.slane %v195_v53, %v1760_v10  ;;  %v178_v57 = vcombine.high %v168_v55, %v168_v55  ;;  %v1887_v58 = vrot.slane %v168_v55, %v1760_v10  ;;  %v1906_v63 = vcombine.high %v1881_v54, %v1881_v54 }
  0xe9   :  { %v1894_v60 = vrot.slane %v178_v57, %v1760_v10  ;;  %v1898_v61 = vcombine.high %v1884_v56, %v1884_v56  ;;  %v1902_v62 = vcombine.high %v1887_v58, %v1887_v58  ;;  %v467_v57 = vsub.f32 1.0, %v225_v52 }
  0xeb   :  { %v247_v0 = vsel %vm1889_vm1, %v1887_v58, %v1898_v61  ;;  %v360_v1 = vsel %vm1889_vm1, %v1902_v62, %v1884_v56  ;;  %v477_v2 = vsel %vm1889_vm1, %v1894_v60, %v1906_v63  ;;  %v1922_v3 = vcombine.high %v1894_v60, %v1894_v60 }
  0xec   :  { %v319_v4 = vadd.f32 %v318_v45, %v247_v0  ;;  %v828_v6 = vsel %vm1889_vm1, %v1906_v63, %v1894_v60  ;;  %v945_v7 = vsel %vm1889_vm1, %v1884_v56, %v1902_v62  ;;  %v1062_v8 = vsel %vm1889_vm1, %v1898_v61, %v1887_v58 }
  0xed   :  { %v594_v9 = vsel %vm1889_vm1, %v1922_v3, %v1881_v54  ;;  %v711_v10 = vsel %vm1889_vm1, %v1881_v54, %v1922_v3 }
  0xee   :  { %1633 = vtanh.f32 %v319_v4  ;;  %v1403_v12 = vmul.f32 -1.442695, %v319_v4 }
  0xf0   :  { %1635 = vpow2.f32 %v1403_v12 }
  0xfb   :  { %v1634_v11 = vpop.eup %1633 }
  0xfc   :  { %331 = vrot.lane.b32.xlu0 %v1634_v11, %s1700_s3 }
  0xfd   :  { %v1636_v13 = vpop.eup %1635 }
  0xfe   :  { %v325_v14 = vadd.f32 1.0, %v1636_v13 }
 0x100   :  { %1637 = vrcp.f32 %v325_v14 }
 0x10d   :  { %v1638_v15 = vpop.eup %1637 }
 0x10e   :  { %v329_v18 = vmul.f32 0.0, %v1638_v15 }
 0x16e   :  { %v332_v16 = vpop.permute.xlu0 %331 }
 0x16f   :  { %v334_v17 = vmul.f32 %v1638_v15, %v332_v16 }
 0x171   :  { %336 = vrot.lane.b32.xlu0 %v334_v17, %s1701_s10 }
 0x1e3   :  { %v337_v19 = vpop.permute.xlu0 %336 }
 0x1e4   :  { %v339_v22 = vadd.f32 %v337_v19, %v329_v18 }
 0x1e6   :  { %1639 = vtanh.f32 %v339_v22  ;;  %347 = vrot.lane.b32.xlu0 %v339_v22, %s1702_s11 }
 0x1f3   :  { %v1640_v23 = vpop.eup %1639 }
 0x1f4   :  { %342 = vrot.lane.b32.xlu1 %v1640_v23, %s1700_s3 }
 0x258   :  { %v348_v29 = vpop.permute.xlu0 %347 }
 0x259   :  { %v350_v30 = vmul.f32 %v348_v29, %v224_v24 }
 0x25b   :  { %v353_v31 = vadd.f32 %v352_v28, %v350_v30 }
 0x25d   :  { %442 = vrot.lane.b32.xlu0 %v353_v31, %s1701_s10 }
 0x266   :  { %v343_v32 = vpop.permute.xlu1 %342 }
 0x267   :  { %v345_v33 = vmul.f32 %v1638_v15, %v343_v32 }
 0x269   :  { %355 = vrot.lane.b32.xlu1 %v345_v33, %s1701_s10 }
 0x2cf   :  { %v443_v47 = vpop.permute.xlu0 %442 }
 0x2db   :  { %v356_v34 = vpop.permute.xlu1 %355 }
 0x2dc   :  { %v1953_v35 = vmul.f32 %v356_v34, %v224_v24  ;;  %v226_v34 = vld [vmem:[%s2166_s1 + $0x4] sm:$0x3] }
 0x2de   :  { %v359_v36 = vadd.f32 %v1953_v35, %v352_v28 }
 0x2e0   :  { %1544 = vmatmul.mubr.msk.f32.vlgmr.msra.gmra.mxu1 %vm248_vm2, %v359_v36  ;;  %v475_v13 = vmul.f32 %v467_v57, %v359_v36 }
 0x2e1   :  { %1547 = vmatpush3.msra.mxu1 %v1784_v20  ;;  %1554 = vmatprep.mubr.msk.f32.mxu1 %vm1699_vm0, %v1698_v5 }
 0x2e2   :  { %1548 = vmatprep.subr.mxu1 %v1698_v5 }
 0x2e3   :  { %1549 = vmatpush3.msra.mxu1 %v1789_v21 }
 0x2e4   :  { %1550 = vmatprep.subr.mxu1 %v1698_v5 }
 0x2e5   :  { %1551 = vmatpush3.msra.mxu1 %v1801_v25 }
 0x2e6   :  { %1552 = vmatprep.subr.mxu1 %v1698_v5 }
 0x2e7   :  { %1553 = vmatpush3.msra.mxu1 %v1810_v27 }
 0x2e8   :  { %1557 = vmatprep.subr.mxu1 %v1698_v5 }
 0x3a0   :  { %v430_v37 = vpop.f32.mrf.mxu1 }
 0x3a1   :  { %v431_v38 = vadd.f32 %v430_v37, %v360_v1  ;;  %v468_v1 = vmul.f32 %v467_v57, %v353_v31 }
 0x3a2   :  { %v1545_v39 = vpop.f32.mrf.mxu1 }
 0x3a3   :  { %1641 = vtanh.f32 %v431_v38  ;;  %v1405_v41 = vmul.f32 -1.442695, %v431_v38  ;;  %v584_v38 = vsub.f32 1.0, %v226_v34 }
 0x3a5   :  { %1643 = vpow2.f32 %v1405_v41 }
 0x3b0   :  { %v1642_v40 = vpop.eup %1641 }
 0x3b1   :  { %447 = vrot.lane.b32.xlu1 %v1642_v40, %s1700_s3 }
 0x3b2   :  { %v1644_v42 = vpop.eup %1643 }
 0x3b3   :  { %v437_v43 = vadd.f32 1.0, %v1644_v42 }
 0x3b5   :  { %1645 = vrcp.f32 %v437_v43 }
 0x3c2   :  { %v1646_v44 = vpop.eup %1645 }
 0x3c3   :  { %v445_v48 = vmul.f32 %v1646_v44, %v443_v47 }
 0x423   :  { %v448_v45 = vpop.permute.xlu1 %447 }
 0x424   :  { %v450_v46 = vmul.f32 %v1646_v44, %v448_v45 }
 0x426   :  { %452 = vrot.lane.b32.xlu1 %v450_v46, %s1701_s10 }
 0x498   :  { %v453_v49 = vpop.permute.xlu1 %452 }
 0x499   :  { %v455_v50 = vadd.f32 %v453_v49, %v445_v48 }
 0x49b   :  { %1647 = vtanh.f32 %v455_v50 }
 0x4a8   :  { %v1648_v51 = vpop.eup %1647 }
 0x4a9   :  { %458 = vrot.lane.b32.xlu0 %v1648_v51, %s1700_s3 }
 0x4ad   :  { %463 = vrot.lane.b32.xlu0 %v455_v50, %s1702_s11 }
 0x51b   :  { %v459_v53 = vpop.permute.xlu0 %458 }
 0x51c   :  { %v461_v55 = vmul.f32 %v1646_v44, %v459_v53 }
 0x51e   :  { %471 = vrot.lane.b32.xlu1 %v461_v55, %s1701_s10 }
 0x51f   :  { %v464_v0 = vpop.permute.xlu0 %463 }
 0x520   :  { %v466_v4 = vmul.f32 %v464_v0, %v225_v52 }
 0x522   :  { %v469_v11 = vadd.f32 %v468_v1, %v466_v4 }
 0x524   :  { %559 = vrot.lane.b32.xlu0 %v469_v11, %s1701_s10  ;;  %v585_v40 = vmul.f32 %v584_v38, %v469_v11 }
 0x590   :  { %v472_v12 = vpop.permute.xlu1 %471 }
 0x591   :  { %v1976_v14 = vmul.f32 %v472_v12, %v225_v52 }
 0x593   :  { %v476_v15 = vadd.f32 %v475_v13, %v1976_v14  ;;  %v1170_v43 = vrot.slane %v1976_v14, 6 }
 0x595   :  { %1555 = vmatmul.mubr.msk.f32.vlgmr.msra.gmra.mxu1 %vm248_vm2, %v476_v15  ;;  %v592_v45 = vmul.f32 %v584_v38, %v476_v15  ;;  %v1188_v49 = vsel %vm1187_vm3, %v1953_v35, %v1170_v43 }
 0x596   :  { %1558 = vmatpush3.msra.mxu1 %v1784_v20  ;;  %1565 = vmatprep.mubr.msk.f32.mxu1 %vm1699_vm0, %v1698_v5  ;;  %v560_v30 = vpop.permute.xlu0 %559 }
 0x597   :  { %1559 = vmatprep.subr.mxu1 %v1698_v5 }
 0x598   :  { %1560 = vmatpush3.msra.mxu1 %v1789_v21 }
 0x599   :  { %1561 = vmatprep.subr.mxu1 %v1698_v5 }
 0x59a   :  { %1562 = vmatpush3.msra.mxu1 %v1801_v25 }
 0x59b   :  { %1563 = vmatprep.subr.mxu1 %v1698_v5 }
 0x59c   :  { %1564 = vmatpush3.msra.mxu1 %v1810_v27 }
 0x59d   :  { %1579 = vmatprep.subr.mxu1 %v1698_v5 }
 0x655   :  { %v547_v16 = vpop.f32.mrf.mxu1 }
 0x656   :  { %v548_v17 = vadd.f32 %v547_v16, %v477_v2 }
 0x657   :  { %v1556_v18 = vpop.f32.mrf.mxu1 }
 0x658   :  { %1649 = vtanh.f32 %v548_v17  ;;  %v1407_v22 = vmul.f32 -1.442695, %v548_v17  ;;  %v227_v18 = vld [vmem:[%s2166_s1 + $0x6] sm:$0x3] }
 0x65a   :  { %1651 = vpow2.f32 %v1407_v22 }
 0x665   :  { %v1650_v19 = vpop.eup %1649 }
 0x666   :  { %564 = vrot.lane.b32.xlu1 %v1650_v19, %s1700_s3 }
 0x667   :  { %v1652_v23 = vpop.eup %1651 }
 0x668   :  { %v554_v24 = vadd.f32 1.0, %v1652_v23  ;;  %v701_v23 = vsub.f32 1.0, %v227_v18 }
 0x66a   :  { %1653 = vrcp.f32 %v554_v24 }
 0x677   :  { %v1654_v26 = vpop.eup %1653 }
 0x678   :  { %v562_v31 = vmul.f32 %v1654_v26, %v560_v30 }
 0x6d8   :  { %v565_v28 = vpop.permute.xlu1 %564 }
 0x6d9   :  { %v567_v29 = vmul.f32 %v1654_v26, %v565_v28 }
 0x6db   :  { %569 = vrot.lane.b32.xlu1 %v567_v29, %s1701_s10 }
 0x74d   :  { %v570_v32 = vpop.permute.xlu1 %569 }
 0x74e   :  { %v572_v33 = vadd.f32 %v570_v32, %v562_v31 }
 0x750   :  { %1655 = vtanh.f32 %v572_v33 }
 0x75d   :  { %v1656_v2 = vpop.eup %1655 }
 0x75e   :  { %575 = vrot.lane.b32.xlu0 %v1656_v2, %s1700_s3  ;;  %v1205_v2 = vrot.slane %v1976_v14, 4 }
 0x762   :  { %580 = vrot.lane.b32.xlu0 %v572_v33, %s1702_s11 }
 0x7d0   :  { %v576_v36 = vpop.permute.xlu0 %575 }
 0x7d1   :  { %v578_v37 = vmul.f32 %v1654_v26, %v576_v36 }
 0x7d3   :  { %588 = vrot.lane.b32.xlu1 %v578_v37, %s1701_s10 }
 0x7d4   :  { %v581_v39 = vpop.permute.xlu0 %580 }
 0x7d5   :  { %v583_v41 = vmul.f32 %v581_v39, %v226_v34 }
 0x7d7   :  { %v586_v42 = vadd.f32 %v585_v40, %v583_v41 }
 0x7d9   :  { %676 = vrot.lane.b32.xlu0 %v586_v42, %s1701_s10  ;;  %v702_v26 = vmul.f32 %v701_v23, %v586_v42 }
 0x845   :  { %v589_v44 = vpop.permute.xlu1 %588 }
 0x846   :  { %v591_v46 = vmul.f32 %v589_v44, %v226_v34 }
 0x848   :  { %v593_v47 = vadd.f32 %v592_v45, %v591_v46  ;;  %v1173_v48 = vrot.slane %v591_v46, 4  ;;  %v1203_v31 = vrot.slane %v591_v46, 6 }
 0x84a   :  { %1566 = vmatmul.mubr.msk.f32.vlgmr.msra.gmra.mxu1 %vm248_vm2, %v593_v47  ;;  %v1190_v50 = vsel %vm1189_vm4, %v1188_v49, %v1173_v48  ;;  %v709_v32 = vmul.f32 %v701_v23, %v593_v47 }
 0x84b   :  { %1580 = vmatpush3.msra.mxu1 %v1784_v20  ;;  %1587 = vmatprep.mubr.msk.f32.mxu1 %vm1699_vm0, %v1698_v5  ;;  %v677_v13 = vpop.permute.xlu0 %676 }
 0x84c   :  { %1581 = vmatprep.subr.mxu1 %v1698_v5 }
 0x84d   :  { %1582 = vmatpush3.msra.mxu1 %v1789_v21 }
 0x84e   :  { %1583 = vmatprep.subr.mxu1 %v1698_v5 }
 0x84f   :  { %1584 = vmatpush3.msra.mxu1 %v1801_v25 }
 0x850   :  { %1585 = vmatprep.subr.mxu1 %v1698_v5 }
 0x851   :  { %1586 = vmatpush3.msra.mxu1 %v1810_v27 }
 0x852   :  { %1601 = vmatprep.subr.mxu1 %v1698_v5 }
 0x90a   :  { %v664_v51 = vpop.f32.mrf.mxu1 }
 0x90b   :  { %v665_v52 = vadd.f32 %v664_v51, %v594_v9 }
 0x90c   :  { %v1567_v53 = vpop.f32.mrf.mxu1 }
 0x90d   :  { %1657 = vtanh.f32 %v665_v52  ;;  %v1409_v57 = vmul.f32 -1.442695, %v665_v52 }
 0x90f   :  { %1659 = vpow2.f32 %v1409_v57 }
 0x91a   :  { %v1658_v55 = vpop.eup %1657 }
 0x91b   :  { %681 = vrot.lane.b32.xlu1 %v1658_v55, %s1700_s3 }
 0x91c   :  { %v1660_v0 = vpop.eup %1659 }
 0x91d   :  { %v671_v1 = vadd.f32 1.0, %v1660_v0 }
 0x91f   :  { %1661 = vrcp.f32 %v671_v1 }
 0x92c   :  { %v1662_v4 = vpop.eup %1661 }
 0x92d   :  { %v679_v15 = vmul.f32 %v1662_v4, %v677_v13 }
 0x98d   :  { %v682_v11 = vpop.permute.xlu1 %681 }
 0x98e   :  { %v684_v12 = vmul.f32 %v1662_v4, %v682_v11 }
 0x990   :  { %686 = vrot.lane.b32.xlu1 %v684_v12, %s1701_s10 }
 0xa02   :  { %v687_v16 = vpop.permute.xlu1 %686 }
 0xa03   :  { %v689_v17 = vadd.f32 %v687_v16, %v679_v15 }
 0xa05   :  { %1663 = vtanh.f32 %v689_v17 }
 0xa12   :  { %v1664_v9 = vpop.eup %1663 }
 0xa13   :  { %692 = vrot.lane.b32.xlu0 %v1664_v9, %s1700_s3 }
 0xa17   :  { %697 = vrot.lane.b32.xlu0 %v689_v17, %s1702_s11 }
 0xa85   :  { %v693_v19 = vpop.permute.xlu0 %692 }
 0xa86   :  { %v695_v22 = vmul.f32 %v1662_v4, %v693_v19 }
 0xa88   :  { %705 = vrot.lane.b32.xlu1 %v695_v22, %s1701_s10 }
 0xa89   :  { %v698_v24 = vpop.permute.xlu0 %697 }
 0xa8a   :  { %v700_v28 = vmul.f32 %v698_v24, %v227_v18 }
 0xa8c   :  { %v703_v29 = vadd.f32 %v702_v26, %v700_v28 }
 0xa8e   :  { %793 = vrot.lane.b32.xlu0 %v703_v29, %s1701_s10 }
 0xafa   :  { %v706_v30 = vpop.permute.xlu1 %705 }
 0xafb   :  { %v708_v33 = vmul.f32 %v706_v30, %v227_v18 }
 0xafd   :  { %v710_v34 = vadd.f32 %v709_v32, %v708_v33  ;;  %v1176_v36 = vrot.slane %v708_v33, 2  ;;  %v1213_v37 = vsel %vm1187_vm3, %v708_v33, %v1203_v31 }
 0xafe   :  { %v2036_v38 = vsel %vm1189_vm4, %v1213_v37, %v1205_v2 }
 0xaff   :  { %1577 = vmatmul.mubr.msk.f32.vlgmr.msra.gmra.mxu0 %vm248_vm2, %v710_v34  ;;  %v2040_v39 = vsel %vm1191_vm5, %v1190_v50, %v1176_v36 }
 0xb00   :  { %1591 = vmatpush3.msra.mxu0 %v1784_v20  ;;  %1598 = vmatprep.mubr.msk.f32.mxu0 %vm1699_vm0, %v1698_v5  ;;  %v794_v49 = vpop.permute.xlu0 %793 }
 0xb01   :  { %1592 = vmatprep.subr.mxu0 %v1698_v5 }
 0xb02   :  { %1593 = vmatpush3.msra.mxu0 %v1789_v21 }
 0xb03   :  { %1594 = vmatprep.subr.mxu0 %v1698_v5 }
 0xb04   :  { %1595 = vmatpush3.msra.mxu0 %v1801_v25 }
 0xb05   :  { %1596 = vmatprep.subr.mxu0 %v1698_v5 }
 0xb06   :  { %1597 = vmatpush3.msra.mxu0 %v1810_v27 }
 0xbbf   :  { %v781_v14 = vpop.f32.mrf.mxu0 }
 0xbc0   :  { %v782_v40 = vadd.f32 %v781_v14, %v711_v10  ;;  %v228_v10 = vld [vmem:[%s2166_s1 + $0x8] sm:$0x3] }
 0xbc1   :  { %v1578_v41 = vpop.f32.mrf.mxu0  ;;  %v818_v55 = vsub.f32 1.0, %v228_v10 }
 0xbc2   :  { %1665 = vtanh.f32 %v782_v40  ;;  %v1411_v43 = vmul.f32 -1.442695, %v782_v40 }
 0xbc3   :  { %v819_v1 = vmul.f32 %v818_v55, %v703_v29  ;;  %v826_v12 = vmul.f32 %v818_v55, %v710_v34 }
 0xbc4   :  { %1667 = vpow2.f32 %v1411_v43 }
 0xbcf   :  { %v1666_v42 = vpop.eup %1665 }
 0xbd0   :  { %798 = vrot.lane.b32.xlu1 %v1666_v42, %s1700_s3 }
 0xbd1   :  { %v1668_v44 = vpop.eup %1667 }
 0xbd2   :  { %v788_v45 = vadd.f32 1.0, %v1668_v44 }
 0xbd4   :  { %1669 = vrcp.f32 %v788_v45 }
 0xbe1   :  { %v1670_v46 = vpop.eup %1669 }
 0xbe2   :  { %v796_v50 = vmul.f32 %v1670_v46, %v794_v49 }
 0xc42   :  { %v799_v47 = vpop.permute.xlu1 %798 }
 0xc43   :  { %v801_v48 = vmul.f32 %v1670_v46, %v799_v47 }
 0xc45   :  { %803 = vrot.lane.b32.xlu1 %v801_v48, %s1701_s10 }
 0xcb7   :  { %v804_v51 = vpop.permute.xlu1 %803 }
 0xcb8   :  { %v806_v54 = vadd.f32 %v804_v51, %v796_v50 }
 0xcba   :  { %1671 = vtanh.f32 %v806_v54 }
 0xcc7   :  { %v1672_v3 = vpop.eup %1671 }
 0xcc8   :  { %809 = vrot.lane.b32.xlu0 %v1672_v3, %s1700_s3 }
 0xccc   :  { %814 = vrot.lane.b32.xlu0 %v806_v54, %s1702_s11 }
 0xd3a   :  { %v810_v52 = vpop.permute.xlu0 %809 }
 0xd3b   :  { %v812_v53 = vmul.f32 %v1670_v46, %v810_v52 }
 0xd3d   :  { %822 = vrot.lane.b32.xlu1 %v812_v53, %s1701_s10 }
 0xd3e   :  { %v815_v57 = vpop.permute.xlu0 %814 }
 0xd3f   :  { %v817_v0 = vmul.f32 %v815_v57, %v228_v10 }
 0xd41   :  { %v820_v4 = vadd.f32 %v819_v1, %v817_v0 }
 0xd43   :  { %910 = vrot.lane.b32.xlu0 %v820_v4, %s1701_s10 }
 0xdaf   :  { %v823_v11 = vpop.permute.xlu1 %822 }
 0xdb0   :  { %v2065_v13 = vmul.f32 %v823_v11, %v228_v10 }
 0xdb2   :  { %v827_v15 = vadd.f32 %v826_v12, %v2065_v13 }
 0xdb4   :  { %1588 = vmatmul.mubr.msk.f32.vlgmr.msra.gmra.mxu1 %vm248_vm2, %v827_v15 }
 0xdb5   :  { %1602 = vmatpush3.msra.mxu1 %v1784_v20  ;;  %1609 = vmatprep.mubr.msk.f32.mxu1 %vm1699_vm0, %v1698_v5  ;;  %v911_v22 = vpop.permute.xlu0 %910 }
 0xdb6   :  { %1603 = vmatprep.subr.mxu1 %v1698_v5 }
 0xdb7   :  { %1604 = vmatpush3.msra.mxu1 %v1789_v21 }
 0xdb8   :  { %1605 = vmatprep.subr.mxu1 %v1698_v5 }
 0xdb9   :  { %1606 = vmatpush3.msra.mxu1 %v1801_v25 }
 0xdba   :  { %1607 = vmatprep.subr.mxu1 %v1698_v5 }
 0xdbb   :  { %1608 = vmatpush3.msra.mxu1 %v1810_v27 }
 0xe74   :  { %v898_v16 = vpop.f32.mrf.mxu1 }
 0xe75   :  { %v899_v20 = vadd.f32 %v898_v16, %v828_v6  ;;  %v229_v6 = vld [vmem:[%s2166_s1 + $0xa] sm:$0x3] }
 0xe76   :  { %v1589_v17 = vpop.f32.mrf.mxu1  ;;  %v935_v29 = vsub.f32 1.0, %v229_v6 }
 0xe77   :  { %1673 = vtanh.f32 %v899_v20  ;;  %v1413_v21 = vmul.f32 -1.442695, %v899_v20 }
 0xe78   :  { %v936_v32 = vmul.f32 %v935_v29, %v820_v4  ;;  %v943_v34 = vmul.f32 %v935_v29, %v827_v15  ;;  %v1208_v29 = vrot.slane %v1953_v35, 2 }
 0xe79   :  { %1675 = vpow2.f32 %v1413_v21 }
 0xe84   :  { %v1674_v9 = vpop.eup %1673 }
 0xe85   :  { %915 = vrot.lane.b32.xlu1 %v1674_v9, %s1700_s3 }
 0xe86   :  { %v1676_v18 = vpop.eup %1675 }
 0xe87   :  { %v905_v25 = vadd.f32 1.0, %v1676_v18 }
 0xe89   :  { %1677 = vrcp.f32 %v905_v25 }
 0xe96   :  { %v1678_v5 = vpop.eup %1677 }
 0xe97   :  { %v913_v23 = vmul.f32 %v1678_v5, %v911_v22 }
 0xef7   :  { %v916_v19 = vpop.permute.xlu1 %915 }
 0xef8   :  { %v918_v27 = vmul.f32 %v1678_v5, %v916_v19 }
 0xefa   :  { %920 = vrot.lane.b32.xlu1 %v918_v27, %s1701_s10 }
 0xf6c   :  { %v921_v24 = vpop.permute.xlu1 %920 }
 0xf6d   :  { %v923_v60 = vadd.f32 %v921_v24, %v913_v23 }
 0xf6f   :  { %1679 = vtanh.f32 %v923_v60 }
 0xf7c   :  { %v1680_v63 = vpop.eup %1679 }
 0xf7d   :  { %926 = vrot.lane.b32.xlu0 %v1680_v63, %s1700_s3  ;;  %v1219_v63 = vld [vmem:[%s2167_s5 + $0x18] sm:$0xff] }
 0xf7e   :  { %1612 = vmatprep.subr.mxu0 %v1219_v63 }
 0xf81   :  { %931 = vrot.lane.b32.xlu0 %v923_v60, %s1702_s11  ;;  %v1216_v60 = vld [vmem:[%s2167_s5] sm:$0xff] }
 0xfef   :  { %v927_v26 = vpop.permute.xlu0 %926 }
 0xff0   :  { %v929_v28 = vmul.f32 %v1678_v5, %v927_v26 }
 0xff2   :  { %939 = vrot.lane.b32.xlu1 %v929_v28, %s1701_s10 }
 0xff3   :  { %v932_v30 = vpop.permute.xlu0 %931 }
 0xff4   :  { %v934_v31 = vmul.f32 %v932_v30, %v229_v6  ;;  %v1215_v30 = vsel %vm1191_vm5, %v2036_v38, %v1208_v29 }
 0xff6   :  { %v937_v33 = vadd.f32 %v936_v32, %v934_v31  ;;  %v231_v31 = vld [vmem:[%s2166_s1 + $0xe] sm:$0x3] }
 0xff8   :  { %1027 = vrot.lane.b32.xlu0 %v937_v33, %s1701_s10 }
0x1064   :  { %v940_v2 = vpop.permute.xlu1 %939 }
0x1065   :  { %v2092_v36 = vmul.f32 %v940_v2, %v229_v6  ;;  %v1218_v6 = vld [vmem:[%s2167_s5 + $0x10] sm:$0xff] }
0x1067   :  { %v944_v37 = vadd.f32 %v943_v34, %v2092_v36  ;;  %v1179_v0 = vrot.slane %v2092_v36, 6  ;;  %v1198_v34 = vrot.slane %v2092_v36, 4 }
0x1069   :  { %1599 = vmatmul.mubr.msk.f32.vlgmr.msra.gmra.mxu0 %vm248_vm2, %v944_v37  ;;  %v1193_v16 = vsel %vm1187_vm3, %v2065_v13, %v1179_v0 }
0x106a   :  { %v1028_v49 = vpop.permute.xlu0 %1027  ;;  %1613 = vmatpush3.msra.mxu0 %v1219_v63 }
0x106b   :  { %1614 = vmatprep.subr.mxu0 %v1218_v6 }
0x106c   :  { %1615 = vmatpush3.msra.mxu0 %v1218_v6 }
0x1129   :  { %v1015_v14 = vpop.f32.mrf.mxu0 }
0x112a   :  { %v1016_v40 = vadd.f32 %v1015_v14, %v945_v7  ;;  %v230_v7 = vld [vmem:[%s2166_s1 + $0xc] sm:$0x3] }
0x112b   :  { %v1600_v41 = vpop.f32.mrf.mxu0  ;;  %v1052_v10 = vsub.f32 1.0, %v230_v7 }
0x112c   :  { %1681 = vtanh.f32 %v1016_v40  ;;  %v1415_v43 = vmul.f32 -1.442695, %v1016_v40 }
0x112d   :  { %v1053_v55 = vmul.f32 %v1052_v10, %v937_v33  ;;  %v1060_v4 = vmul.f32 %v1052_v10, %v944_v37  ;;  %v1201_v37 = vrot.slane %v2065_v13, 2 }
0x112e   :  { %1683 = vpow2.f32 %v1415_v43 }
0x1139   :  { %v1682_v42 = vpop.eup %1681 }
0x113a   :  { %1032 = vrot.lane.b32.xlu1 %v1682_v42, %s1700_s3 }
0x113b   :  { %v1684_v44 = vpop.eup %1683 }
0x113c   :  { %v1022_v45 = vadd.f32 1.0, %v1684_v44  ;;  %v1422_v44 = vld [vmem:[%s2168_s6] ss:$0 sm:$0xff] }
0x113e   :  { %1685 = vrcp.f32 %v1022_v45 }
0x114b   :  { %v1686_v46 = vpop.eup %1685 }
0x114c   :  { %v1030_v50 = vmul.f32 %v1686_v46, %v1028_v49 }
0x11ac   :  { %v1033_v47 = vpop.permute.xlu1 %1032 }
0x11ad   :  { %v1035_v48 = vmul.f32 %v1686_v46, %v1033_v47 }
0x11af   :  { %1037 = vrot.lane.b32.xlu1 %v1035_v48, %s1701_s10 }
0x1221   :  { %v1038_v51 = vpop.permute.xlu1 %1037 }
0x1222   :  { %v1040_v56 = vadd.f32 %v1038_v51, %v1030_v50 }
0x1224   :  { %1687 = vtanh.f32 %v1040_v56 }
0x1231   :  { %v1688_v62 = vpop.eup %1687 }
0x1232   :  { %1043 = vrot.lane.b32.xlu0 %v1688_v62, %s1700_s3 }
0x1236   :  { %1048 = vrot.lane.b32.xlu0 %v1040_v56, %s1702_s11 }
0x12a4   :  { %v1044_v54 = vpop.permute.xlu0 %1043 }
0x12a5   :  { %v1046_v3 = vmul.f32 %v1686_v46, %v1044_v54 }
0x12a7   :  { %1056 = vrot.lane.b32.xlu1 %v1046_v3, %s1701_s10 }
0x12a8   :  { %v1049_v52 = vpop.permute.xlu0 %1048 }
0x12a9   :  { %v1051_v53 = vmul.f32 %v1049_v52, %v230_v7 }
0x12ab   :  { %v1054_v57 = vadd.f32 %v1053_v55, %v1051_v53 }
0x12ad   :  { %1144 = vrot.lane.b32.xlu0 %v1054_v57, %s1701_s10 }
0x1319   :  { %v1057_v1 = vpop.permute.xlu1 %1056 }
0x131a   :  { %v1059_v11 = vmul.f32 %v1057_v1, %v230_v7 }
0x131c   :  { %v1061_v12 = vadd.f32 %v1060_v4, %v1059_v11  ;;  %v1182_v15 = vrot.slane %v1059_v11, 4  ;;  %v1196_v33 = vrot.slane %v1059_v11, 6 }
0x131e   :  { %1610 = vmatmul.mubr.msk.f32.vlgmr.msra.gmra.mxu1 %vm248_vm2, %v1061_v12  ;;  %v1194_v20 = vsel %vm1189_vm4, %v1193_v16, %v1182_v15 }
0x131f   :  { %1623 = vmatprep.mubr.msk.f32.mxu1 %vm1226_vm6, %v2040_v39  ;;  %v1145_v59 = vpop.permute.xlu0 %1144 }
0x13de   :  { %v1132_v17 = vpop.f32.mrf.mxu1 }
0x13df   :  { %v1133_v9 = vadd.f32 %v1132_v17, %v1062_v8  ;;  %v1217_v8 = vld [vmem:[%s2167_s5 + $0x8] sm:$0xff] }
0x13e0   :  { %v1611_v21 = vpop.f32.mrf.mxu1  ;;  %1619 = vmatprep.subr.mxu1 %v1217_v8 }
0x13e1   :  { %1689 = vtanh.f32 %v1133_v9  ;;  %v1417_v25 = vmul.f32 -1.442695, %v1133_v9  ;;  %1620 = vmatpush3.msra.mxu1 %v1217_v8 }
0x13e2   :  { %1621 = vmatprep.subr.mxu1 %v1216_v60 }
0x13e3   :  { %1691 = vpow2.f32 %v1417_v25  ;;  %1622 = vmatpush3.msra.mxu1 %v1216_v60 }
0x13ee   :  { %v1690_v18 = vpop.eup %1689 }
0x13ef   :  { %1149 = vrot.lane.b32.xlu1 %v1690_v18, %s1700_s3 }
0x13f0   :  { %v1692_v5 = vpop.eup %1691 }
0x13f1   :  { %v1139_v19 = vadd.f32 1.0, %v1692_v5 }
0x13f3   :  { %1693 = vrcp.f32 %v1139_v19 }
0x1400   :  { %v1694_v27 = vpop.eup %1693 }
0x1401   :  { %v1147_v23 = vmul.f32 %v1694_v27, %v1145_v59 }
0x1461   :  { %v1150_v22 = vpop.permute.xlu1 %1149 }
0x1462   :  { %v1152_v39 = vmul.f32 %v1694_v27, %v1150_v22 }
0x1464   :  { %1154 = vrot.lane.b32.xlu1 %v1152_v39, %s1701_s10 }
0x14d6   :  { %v1155_v24 = vpop.permute.xlu1 %1154 }
0x14d7   :  { %v1157_v58 = vadd.f32 %v1155_v24, %v1147_v23 }
0x14d9   :  { %1695 = vtanh.f32 %v1157_v58 }
0x14e6   :  { %v1696_v61 = vpop.eup %1695 }
0x14e7   :  { %1160 = vrot.lane.b32.xlu0 %v1696_v61, %s1700_s3 }
0x1559   :  { %v1161_v26 = vpop.permute.xlu0 %1160 }
0x155a   :  { %v1163_v28 = vmul.f32 %v1694_v27, %v1161_v26 }
0x155c   :  { %1165 = vrot.lane.b32.xlu1 %v1163_v28, %s1701_s10 }
0x1560   :  { %1224 = vrot.lane.b32.xlu1 %v1215_v30, %s1703_s2 }
0x15ce   :  { %v1166_v32 = vpop.permute.xlu1 %1165 }
0x15cf   :  { %v1168_v2 = vmul.f32 %v1166_v32, %v231_v31 }
0x15d1   :  { %v1185_v14 = vrot.slane %v1168_v2, 2  ;;  %v1210_v40 = vsel %vm1187_vm3, %v1168_v2, %v1196_v33 }
0x15d2   :  { %v1211_v35 = vsel %vm1189_vm4, %v1210_v40, %v1198_v34  ;;  %v1225_v43 = vpop.permute.xlu1 %1224 }
0x15d3   :  { %v1212_v38 = vsel %vm1191_vm5, %v1211_v35, %v1201_v37  ;;  %v1195_v41 = vsel %vm1191_vm5, %v1194_v20, %v1185_v14 }
0x15d4   :  { %1222 = vrot.lane.b32.xlu0 %v1212_v38, %s1703_s2  ;;  %1624 = vmatmul.mubr.msk.f32.vlgmr.msra.gmra.mxu1 %vm1226_vm6, %v1195_v41 }
0x1646   :  { %v1223_v42 = vpop.permute.xlu0 %1222 }
0x1647   :  { %1616 = vmatprep.mubr.msk.f32.mxu0 %vm1226_vm6, %v1223_v42 }
0x1648   :  { %1617 = vmatmul.mubr.msk.f32.vlgmr.msra.gmra.mxu0 %vm1226_vm6, %v1225_v43 }
0x1694   :  { %v1625_v36 = vpop.f32.mrf.mxu1 }
0x1696   :  { %v1378_v46 = vpop.f32.mrf.mxu1 }
0x1708   :  { %v1618_v13 = vpop.f32.mrf.mxu0 }
0x1709   :  { %v1384_v45 = vadd.f32 %v1625_v36, %v1618_v13 }
0x170a   :  { %v1297_v47 = vpop.f32.mrf.mxu0 }
0x170b   :  { %v1395_v48 = vadd.f32 %v1422_v44, %v1384_v45  ;;  %v1379_v49 = vadd.f32 %v1378_v46, %v1297_v47 }
0x170d   :  { %1397 = vst [vmem:[%s2169_s7 + $0x8] sm:$0xff] %v1395_v48  ;;  %v1394_v50 = vadd.f32 %v1422_v44, %v1379_v49 }
0x170f   :  { %1396 = vst [vmem:[%s2169_s7] sm:$0xff] %v1394_v50 }

</bundles_post_ra>
